<compile_context>
chip_gen: v5e
topology: v5e:2x2
jax: 0.10.0
libtpu: 0.0.40
codegen_flags: <defaults>
</compile_context>

<pallas_src>
import functools
import math

import jax
import jax.numpy as jnp
from jax import lax
from jax.experimental import pallas as pl
from jax.experimental.pallas import tpu as pltpu


def _silu(x):
    return x * jax.nn.sigmoid(x)


def _gelu_exact(x):
    # PyTorch nn.GELU() default is the exact (erf) form.
    return 0.5 * x * (1.0 + lax.erf(x / jnp.sqrt(2.0).astype(x.dtype)))


def mamba_block_kernel(x_ref, w_in_x_ref, w_in_z_ref, w_dt_ref, b_dt_ref,
                       a_ref, d_ref, w_out_ref, gamma_ref, beta_ref,
                       w1_ref, b1_ref, w2_ref, b2_ref, o_ref, *, seq_len):
    x = x_ref[...]                                   # (TM, D) f32, rows = packed (batch, seq)
    x_bf = x.astype(jnp.bfloat16)

    # ---------------- LightweightS6Layer ----------------
    # in_proj split into two lane-contiguous bf16 matmuls (f32 MXU accumulation).
    xs = _silu(jnp.dot(x_bf, w_in_x_ref[...], preferred_element_type=jnp.float32))   # (TM, Hi)
    z = jnp.dot(x_bf, w_in_z_ref[...], preferred_element_type=jnp.float32)           # (TM, Hi)

    dt = jnp.dot(xs.astype(jnp.bfloat16), w_dt_ref[...],
                 preferred_element_type=jnp.float32) + b_dt_ref[...]                 # (TM, S)
    dt = jnp.clip(dt, 0.001, 0.1)

    # State update with xs factored out and the small d_state loop unrolled (no 3-D tensors):
    #   term = xs * sum_s dt_s * exp(dt_s * A_s)
    # (sum over state commutes with the per-sequence cumsum over the sequence axis).
    # A = -exp(clip(A_log, -10, 2)) is precomputed host-side; dt*A lies in (-0.739, 0), so the
    # reference's clip of dt*A to [-10, 10] is a no-op and is dropped.
    a = a_ref[...]                                   # (S, Hi) f32
    acc = jnp.zeros_like(xs)
    for s in range(a.shape[0]):                      # unrolled: d_state is tiny (8)
        dt_s = dt[:, s:s + 1]                        # (TM, 1)
        acc = acc + dt_s * jnp.exp(dt_s * a[s:s + 1, :])
    term = xs * acc                                  # (TM, Hi)

    # Per-sequence inclusive cumsum: log2(L)-step masked Hillis-Steele scan along sublanes.
    rows = lax.broadcasted_iota(jnp.int32, (term.shape[0], 1), 0)
    within = rows % seq_len                          # position within its sequence
    cum = term
    shift = 1
    while shift < seq_len:
        rolled = pltpu.roll(cum, shift, axis=0)      # rolled[i] = cum[i - shift]
        cum = jnp.where(within >= shift, cum + rolled, cum)   # mask blocks cross-sequence adds
        shift *= 2

    y = cum + xs * d_ref[...]                        # D already clipped host-side
    y = y * _silu(z)
    s6_out = jnp.dot(y.astype(jnp.bfloat16), w_out_ref[...],
                     preferred_element_type=jnp.float32)       # (TM, D)

    # ---------------- residual + LayerNorm (f32) ----------------
    x1 = x + s6_out
    mean = jnp.mean(x1, axis=-1, keepdims=True)
    var = jnp.mean((x1 - mean) ** 2, axis=-1, keepdims=True)
    xn = (x1 - mean) / jnp.sqrt(var + 1e-5)
    xn = xn * gamma_ref[...] + beta_ref[...]

    # ---------------- feed-forward (Dropout = identity at inference) ----------------
    h = jnp.dot(xn.astype(jnp.bfloat16), w1_ref[...],
                preferred_element_type=jnp.float32) + b1_ref[...]
    h = _gelu_exact(h)
    ff = jnp.dot(h.astype(jnp.bfloat16), w2_ref[...],
                 preferred_element_type=jnp.float32) + b2_ref[...]

    o_ref[...] = (x1 + ff).astype(o_ref.dtype)


def simple_mamba3d_block(x, params, *, rows_per_tile=None):
    B, L, D = x.shape
    Hi, S = params["w_dt"].shape
    BL = B * L

    # ---------- row-tile selection ----------
    # Whole sequences per tile, sublane-aligned (TM multiple of 8), TM targeting ~256 rows,
    # but keep >= 2 grid tiles when B >= 2 so both v7x TensorCores get work.  A ragged last
    # tile is handled by padding with whole zero sequences (discarded after the call).
    seq_mult = 8 // math.gcd(L, 8)                   # seqs/tile must be a multiple of this
    if rows_per_tile is None:
        target = max(seq_mult, (256 // (L * seq_mult)) * seq_mult)
        cap = max(seq_mult, (pl.cdiv(B, 2) // seq_mult) * seq_mult)
        seqs_per_tile = min(target, cap)
    else:
        assert rows_per_tile % L == 0 and rows_per_tile % 8 == 0
        seqs_per_tile = rows_per_tile // L
    TM = seqs_per_tile * L
    num_tiles = pl.cdiv(B, seqs_per_tile)
    B_pad = num_tiles * seqs_per_tile

    x2 = x.reshape(BL, D)
    if B_pad != B:
        x2 = jnp.concatenate([x2, jnp.zeros(((B_pad - B) * L, D), x.dtype)], axis=0)

    # ---------- parameter-only precompute, hoisted out of the kernel ----------
    A = -jnp.exp(jnp.clip(params["a_log"], -10.0, 2.0)).astype(jnp.float32)   # (S, Hi)
    d_clip = jnp.clip(params["d"], -10.0, 10.0)                               # (1, Hi)
    bf = jnp.bfloat16
    w_in_x = params["w_in"][:, :Hi].astype(bf)       # lane-contiguous split of in_proj
    w_in_z = params["w_in"][:, Hi:].astype(bf)

    consts = [w_in_x, w_in_z, params["w_dt"].astype(bf), params["b_dt"], A, d_clip,
              params["w_out"].astype(bf), params["gamma"], params["beta"],
              params["w1"].astype(bf), params["b1"], params["w2"].astype(bf), params["b2"]]

    kernel = functools.partial(mamba_block_kernel, seq_len=L)

    def _call(single_buffer_consts):
        def _const_spec(a):
            index_map = lambda i, _n=a.ndim: (0,) * _n
            if single_buffer_consts:
                # Constant-index operands never change block -> single-buffer them.
                return pl.BlockSpec(a.shape, index_map, pipeline_mode=pl.Buffered(1))
            return pl.BlockSpec(a.shape, index_map)

        grid_spec = pltpu.PrefetchScalarGridSpec(
            num_scalar_prefetch=0,
            grid=(num_tiles,),
            in_specs=[pl.BlockSpec((TM, D), lambda i: (i, 0))]
                     + [_const_spec(a) for a in consts],
            out_specs=pl.BlockSpec((TM, D), lambda i: (i, 0)),
        )
        return pl.pallas_call(
            kernel,
            out_shape=jax.ShapeDtypeStruct((B_pad * L, D), x.dtype),
            grid_spec=grid_spec,
            compiler_params=pltpu.CompilerParams(
                dimension_semantics=("parallel",),
                vmem_limit_bytes=32 * 1024 * 1024),
        )(x2, *consts)

    try:
        out2 = _call(True)
    except Exception:
        # pl.Buffered(1) / pipeline_mode not supported on this jax version: default buffering.
        out2 = _call(False)

    return out2[:BL].reshape(B, L, D)


def reference(x, p):
    """Pure-JAX (f32) replica of the PyTorch forward (for validation)."""
    Hi = p["w_dt"].shape[0]
    xz = x @ p["w_in"]
    xs, z = xz[..., :Hi], xz[..., Hi:]
    xs = xs * jax.nn.sigmoid(xs)
    dt = jnp.clip(xs @ p["w_dt"] + p["b_dt"][0], 0.001, 0.1)
    A = -jnp.exp(jnp.clip(p["a_log"], -10.0, 2.0))
    dt_A = jnp.clip(jnp.einsum("bls,sh->blsh", dt, A), -10.0, 10.0)
    dA = jnp.exp(dt_A)
    wi = dt[..., None] * xs[:, :, None, :]
    cum = jnp.cumsum(dA * wi, axis=1)
    y = jnp.sum(cum, axis=2) + xs * jnp.clip(p["d"][0], -10.0, 10.0)
    y = y * (z * jax.nn.sigmoid(z))
    x1 = x + y @ p["w_out"]
    mean = x1.mean(-1, keepdims=True)
    var = ((x1 - mean) ** 2).mean(-1, keepdims=True)
    xn = (x1 - mean) / jnp.sqrt(var + 1e-5) * p["gamma"][0] + p["beta"][0]
    h = xn @ p["w1"] + p["b1"][0]
    h = 0.5 * h * (1.0 + lax.erf(h / jnp.sqrt(2.0)))
    ff = h @ p["w2"] + p["b2"][0]
    return x1 + ff


if __name__ == "__main__":
    B, L, D = 2, 8, 32           # batch, seq, d_model
    d_state = 8
    d_inner = int(D * 1.5)       # expand = 1.5 -> 48

    key = jax.random.PRNGKey(0)
    keys = jax.random.split(key, 9)
    f32 = jnp.float32
    params = {
        "w_in":  0.02 * jax.random.normal(keys[0], (D, 2 * d_inner), f32),
        "w_dt":  0.02 * jax.random.normal(keys[1], (d_inner, d_state), f32),
        "b_dt":  0.02 * jax.random.normal(keys[2], (1, d_state), f32),
        "a_log": jnp.full((d_state, d_inner), math.log(0.1), f32),
        "d":     jnp.full((1, d_inner), 0.1, f32),
        "w_out": 0.02 * jax.random.normal(keys[3], (d_inner, D), f32),
        "gamma": jnp.ones((1, D), f32),
        "beta":  jnp.zeros((1, D), f32),
        "w1":    0.02 * jax.random.normal(keys[4], (D, 2 * D), f32),
        "b1":    0.02 * jax.random.normal(keys[5], (1, 2 * D), f32),
        "w2":    0.02 * jax.random.normal(keys[6], (2 * D, D), f32),
        "b2":    0.02 * jax.random.normal(keys[7], (1, D), f32),
    }
    x = jax.random.normal(keys[8], (B, L, D), f32)

    out = simple_mamba3d_block(x, params)
    jax.block_until_ready(out)

    ref = reference(x, params)
    assert out.shape == (B, L, D)
    # bf16 MXU matmuls vs. the f32 reference -> relaxed tolerance
    assert jnp.allclose(out, ref, atol=2e-2, rtol=2e-2), "mismatch vs pure-JAX reference"
    print("KERNEL_OK")
</pallas_src>

<mosaic_0001>
module attributes {stable_mosaic.version = 11 : i64} {
  func.func @mamba_block_kernel(%arg0: i32, %arg1: memref<8x32xf32, #tpu.memory_space<vmem>>, %arg2: memref<32x48xbf16, #tpu.memory_space<vmem>>, %arg3: memref<32x48xbf16, #tpu.memory_space<vmem>>, %arg4: memref<48x8xbf16, #tpu.memory_space<vmem>>, %arg5: memref<1x8xf32, #tpu.memory_space<vmem>>, %arg6: memref<8x48xf32, #tpu.memory_space<vmem>>, %arg7: memref<1x48xf32, #tpu.memory_space<vmem>>, %arg8: memref<48x32xbf16, #tpu.memory_space<vmem>>, %arg9: memref<1x32xf32, #tpu.memory_space<vmem>>, %arg10: memref<1x32xf32, #tpu.memory_space<vmem>>, %arg11: memref<32x64xbf16, #tpu.memory_space<vmem>>, %arg12: memref<1x64xf32, #tpu.memory_space<vmem>>, %arg13: memref<64x32xbf16, #tpu.memory_space<vmem>>, %arg14: memref<1x32xf32, #tpu.memory_space<vmem>>, %arg15: memref<8x32xf32, #tpu.memory_space<vmem>>) attributes {dimension_semantics = [#tpu.dimension_semantics<parallel>], iteration_bounds = array<i64: 2>, scalar_prefetch = 0 : i64, scratch_operands = 0 : i64, tpu.core_type = #tpu.core_type<tc>, window_params = [{transform_indices = @transform_0, window_bounds = array<i64: 8, 32>}, {pipeline_mode = #tpu.pipeline_mode<synchronous>, transform_indices = @transform_1, window_bounds = array<i64: 32, 48>}, {pipeline_mode = #tpu.pipeline_mode<synchronous>, transform_indices = @transform_2, window_bounds = array<i64: 32, 48>}, {pipeline_mode = #tpu.pipeline_mode<synchronous>, transform_indices = @transform_3, window_bounds = array<i64: 48, 8>}, {pipeline_mode = #tpu.pipeline_mode<synchronous>, transform_indices = @transform_4, window_bounds = array<i64: 1, 8>}, {pipeline_mode = #tpu.pipeline_mode<synchronous>, transform_indices = @transform_5, window_bounds = array<i64: 8, 48>}, {pipeline_mode = #tpu.pipeline_mode<synchronous>, transform_indices = @transform_6, window_bounds = array<i64: 1, 48>}, {pipeline_mode = #tpu.pipeline_mode<synchronous>, transform_indices = @transform_7, window_bounds = array<i64: 48, 32>}, {pipeline_mode = #tpu.pipeline_mode<synchronous>, transform_indices = @transform_8, window_bounds = array<i64: 1, 32>}, {pipeline_mode = #tpu.pipeline_mode<synchronous>, transform_indices = @transform_9, window_bounds = array<i64: 1, 32>}, {pipeline_mode = #tpu.pipeline_mode<synchronous>, transform_indices = @transform_10, window_bounds = array<i64: 32, 64>}, {pipeline_mode = #tpu.pipeline_mode<synchronous>, transform_indices = @transform_11, window_bounds = array<i64: 1, 64>}, {pipeline_mode = #tpu.pipeline_mode<synchronous>, transform_indices = @transform_12, window_bounds = array<i64: 64, 32>}, {pipeline_mode = #tpu.pipeline_mode<synchronous>, transform_indices = @transform_13, window_bounds = array<i64: 1, 32>}, {transform_indices = @transform_14, window_bounds = array<i64: 8, 32>}]} {
    %c0 = arith.constant 0 : index
    %c0_0 = arith.constant 0 : index
    %0 = vector.load %arg1[%c0, %c0_0] : memref<8x32xf32, #tpu.memory_space<vmem>>, vector<8x32xf32>
    %1 = arith.truncf %0 : vector<8x32xf32> to vector<8x32xbf16>
    %c0_1 = arith.constant 0 : index
    %c0_2 = arith.constant 0 : index
    %2 = vector.load %arg2[%c0_1, %c0_2] : memref<32x48xbf16, #tpu.memory_space<vmem>>, vector<32x48xbf16>
    %cst = arith.constant dense<0.000000e+00> : vector<8x48xf32>
    %3 = tpu.matmul %1, %2, %cst {dimension_numbers = #tpu.dot_dimension_numbers<[1], [0], [0], [1], [0, 0, 1, 1], [], []>} : vector<8x32xbf16>, vector<32x48xbf16>, vector<8x48xf32> -> vector<8x48xf32>
    %4 = arith.negf %3 : vector<8x48xf32>
    %5 = math.exp %4 : vector<8x48xf32>
    %cst_3 = arith.constant 1.000000e+00 : f32
    %6 = vector.broadcast %cst_3 : f32 to vector<8x48xf32>
    %7 = arith.addf %6, %5 : vector<8x48xf32>
    %8 = arith.divf %6, %7 : vector<8x48xf32>
    %9 = arith.mulf %3, %8 : vector<8x48xf32>
    %c0_4 = arith.constant 0 : index
    %c0_5 = arith.constant 0 : index
    %10 = vector.load %arg3[%c0_4, %c0_5] : memref<32x48xbf16, #tpu.memory_space<vmem>>, vector<32x48xbf16>
    %cst_6 = arith.constant dense<0.000000e+00> : vector<8x48xf32>
    %11 = tpu.matmul %1, %10, %cst_6 {dimension_numbers = #tpu.dot_dimension_numbers<[1], [0], [0], [1], [0, 0, 1, 1], [], []>} : vector<8x32xbf16>, vector<32x48xbf16>, vector<8x48xf32> -> vector<8x48xf32>
    %12 = arith.truncf %9 : vector<8x48xf32> to vector<8x48xbf16>
    %c0_7 = arith.constant 0 : index
    %c0_8 = arith.constant 0 : index
    %13 = vector.load %arg4[%c0_7, %c0_8] : memref<48x8xbf16, #tpu.memory_space<vmem>>, vector<48x8xbf16>
    %cst_9 = arith.constant dense<0.000000e+00> : vector<8x8xf32>
    %14 = tpu.matmul %12, %13, %cst_9 {dimension_numbers = #tpu.dot_dimension_numbers<[1], [0], [0], [1], [0, 0, 1, 1], [], []>} : vector<8x48xbf16>, vector<48x8xbf16>, vector<8x8xf32> -> vector<8x8xf32>
    %c0_10 = arith.constant 0 : index
    %c0_11 = arith.constant 0 : index
    %15 = vector.load %arg5[%c0_10, %c0_11] : memref<1x8xf32, #tpu.memory_space<vmem>>, vector<1x8xf32>
    %16 = vector.broadcast %15 : vector<1x8xf32> to vector<8x8xf32>
    %17 = arith.addf %14, %16 : vector<8x8xf32>
    %cst_12 = arith.constant 1.000000e-03 : f32
    %cst_13 = arith.constant 1.000000e-01 : f32
    %18 = vector.broadcast %cst_12 : f32 to vector<8x8xf32>
    %19 = arith.maximumf %18, %17 : vector<8x8xf32>
    %20 = vector.broadcast %cst_13 : f32 to vector<8x8xf32>
    %21 = arith.minimumf %20, %19 : vector<8x8xf32>
    %c0_14 = arith.constant 0 : index
    %c0_15 = arith.constant 0 : index
    %22 = vector.load %arg6[%c0_14, %c0_15] : memref<8x48xf32, #tpu.memory_space<vmem>>, vector<8x48xf32>
    %cst_16 = arith.constant 0.000000e+00 : f32
    %23 = vector.broadcast %cst_16 : f32 to vector<8x48xf32>
    %24 = vector.extract_strided_slice %21 {offsets = [0, 0], sizes = [8, 1], strides = [1, 1]} : vector<8x8xf32> to vector<8x1xf32>
    %25 = vector.extract_strided_slice %22 {offsets = [0, 0], sizes = [1, 48], strides = [1, 1]} : vector<8x48xf32> to vector<1x48xf32>
    %26 = vector.broadcast %24 : vector<8x1xf32> to vector<8x48xf32>
    %27 = vector.broadcast %25 : vector<1x48xf32> to vector<8x48xf32>
    %28 = arith.mulf %26, %27 : vector<8x48xf32>
    %29 = math.exp %28 : vector<8x48xf32>
    %30 = vector.broadcast %24 : vector<8x1xf32> to vector<8x48xf32>
    %31 = arith.mulf %30, %29 : vector<8x48xf32>
    %32 = arith.addf %23, %31 : vector<8x48xf32>
    %33 = vector.extract_strided_slice %21 {offsets = [0, 1], sizes = [8, 1], strides = [1, 1]} : vector<8x8xf32> to vector<8x1xf32>
    %34 = vector.extract_strided_slice %22 {offsets = [1, 0], sizes = [1, 48], strides = [1, 1]} : vector<8x48xf32> to vector<1x48xf32>
    %35 = vector.broadcast %33 : vector<8x1xf32> to vector<8x48xf32>
    %36 = vector.broadcast %34 : vector<1x48xf32> to vector<8x48xf32>
    %37 = arith.mulf %35, %36 : vector<8x48xf32>
    %38 = math.exp %37 : vector<8x48xf32>
    %39 = vector.broadcast %33 : vector<8x1xf32> to vector<8x48xf32>
    %40 = arith.mulf %39, %38 : vector<8x48xf32>
    %41 = arith.addf %32, %40 : vector<8x48xf32>
    %42 = vector.extract_strided_slice %21 {offsets = [0, 2], sizes = [8, 1], strides = [1, 1]} : vector<8x8xf32> to vector<8x1xf32>
    %43 = vector.extract_strided_slice %22 {offsets = [2, 0], sizes = [1, 48], strides = [1, 1]} : vector<8x48xf32> to vector<1x48xf32>
    %44 = vector.broadcast %42 : vector<8x1xf32> to vector<8x48xf32>
    %45 = vector.broadcast %43 : vector<1x48xf32> to vector<8x48xf32>
    %46 = arith.mulf %44, %45 : vector<8x48xf32>
    %47 = math.exp %46 : vector<8x48xf32>
    %48 = vector.broadcast %42 : vector<8x1xf32> to vector<8x48xf32>
    %49 = arith.mulf %48, %47 : vector<8x48xf32>
    %50 = arith.addf %41, %49 : vector<8x48xf32>
    %51 = vector.extract_strided_slice %21 {offsets = [0, 3], sizes = [8, 1], strides = [1, 1]} : vector<8x8xf32> to vector<8x1xf32>
    %52 = vector.extract_strided_slice %22 {offsets = [3, 0], sizes = [1, 48], strides = [1, 1]} : vector<8x48xf32> to vector<1x48xf32>
    %53 = vector.broadcast %51 : vector<8x1xf32> to vector<8x48xf32>
    %54 = vector.broadcast %52 : vector<1x48xf32> to vector<8x48xf32>
    %55 = arith.mulf %53, %54 : vector<8x48xf32>
    %56 = math.exp %55 : vector<8x48xf32>
    %57 = vector.broadcast %51 : vector<8x1xf32> to vector<8x48xf32>
    %58 = arith.mulf %57, %56 : vector<8x48xf32>
    %59 = arith.addf %50, %58 : vector<8x48xf32>
    %60 = vector.extract_strided_slice %21 {offsets = [0, 4], sizes = [8, 1], strides = [1, 1]} : vector<8x8xf32> to vector<8x1xf32>
    %61 = vector.extract_strided_slice %22 {offsets = [4, 0], sizes = [1, 48], strides = [1, 1]} : vector<8x48xf32> to vector<1x48xf32>
    %62 = vector.broadcast %60 : vector<8x1xf32> to vector<8x48xf32>
    %63 = vector.broadcast %61 : vector<1x48xf32> to vector<8x48xf32>
    %64 = arith.mulf %62, %63 : vector<8x48xf32>
    %65 = math.exp %64 : vector<8x48xf32>
    %66 = vector.broadcast %60 : vector<8x1xf32> to vector<8x48xf32>
    %67 = arith.mulf %66, %65 : vector<8x48xf32>
    %68 = arith.addf %59, %67 : vector<8x48xf32>
    %69 = vector.extract_strided_slice %21 {offsets = [0, 5], sizes = [8, 1], strides = [1, 1]} : vector<8x8xf32> to vector<8x1xf32>
    %70 = vector.extract_strided_slice %22 {offsets = [5, 0], sizes = [1, 48], strides = [1, 1]} : vector<8x48xf32> to vector<1x48xf32>
    %71 = vector.broadcast %69 : vector<8x1xf32> to vector<8x48xf32>
    %72 = vector.broadcast %70 : vector<1x48xf32> to vector<8x48xf32>
    %73 = arith.mulf %71, %72 : vector<8x48xf32>
    %74 = math.exp %73 : vector<8x48xf32>
    %75 = vector.broadcast %69 : vector<8x1xf32> to vector<8x48xf32>
    %76 = arith.mulf %75, %74 : vector<8x48xf32>
    %77 = arith.addf %68, %76 : vector<8x48xf32>
    %78 = vector.extract_strided_slice %21 {offsets = [0, 6], sizes = [8, 1], strides = [1, 1]} : vector<8x8xf32> to vector<8x1xf32>
    %79 = vector.extract_strided_slice %22 {offsets = [6, 0], sizes = [1, 48], strides = [1, 1]} : vector<8x48xf32> to vector<1x48xf32>
    %80 = vector.broadcast %78 : vector<8x1xf32> to vector<8x48xf32>
    %81 = vector.broadcast %79 : vector<1x48xf32> to vector<8x48xf32>
    %82 = arith.mulf %80, %81 : vector<8x48xf32>
    %83 = math.exp %82 : vector<8x48xf32>
    %84 = vector.broadcast %78 : vector<8x1xf32> to vector<8x48xf32>
    %85 = arith.mulf %84, %83 : vector<8x48xf32>
    %86 = arith.addf %77, %85 : vector<8x48xf32>
    %87 = vector.extract_strided_slice %21 {offsets = [0, 7], sizes = [8, 1], strides = [1, 1]} : vector<8x8xf32> to vector<8x1xf32>
    %88 = vector.extract_strided_slice %22 {offsets = [7, 0], sizes = [1, 48], strides = [1, 1]} : vector<8x48xf32> to vector<1x48xf32>
    %89 = vector.broadcast %87 : vector<8x1xf32> to vector<8x48xf32>
    %90 = vector.broadcast %88 : vector<1x48xf32> to vector<8x48xf32>
    %91 = arith.mulf %89, %90 : vector<8x48xf32>
    %92 = math.exp %91 : vector<8x48xf32>
    %93 = vector.broadcast %87 : vector<8x1xf32> to vector<8x48xf32>
    %94 = arith.mulf %93, %92 : vector<8x48xf32>
    %95 = arith.addf %86, %94 : vector<8x48xf32>
    %96 = arith.mulf %9, %95 : vector<8x48xf32>
    %97 = tpu.iota {dimensions = array<i32: 0>} : vector<8x1xi32>
    %c8_i32 = arith.constant 8 : i32
    %c0_i32 = arith.constant 0 : i32
    %98 = arith.cmpi eq, %c8_i32, %c0_i32 : i32
    %c1_i32 = arith.constant 1 : i32
    %99 = arith.select %98, %c1_i32, %c8_i32 : i32
    %100 = vector.broadcast %99 : i32 to vector<8x1xi32>
    %101 = arith.remsi %97, %100 : vector<8x1xi32>
    %c0_i32_17 = arith.constant 0 : i32
    %102 = vector.broadcast %c0_i32_17 : i32 to vector<8x1xi32>
    %103 = arith.cmpi ne, %101, %102 : vector<8x1xi32>
    %c0_i32_18 = arith.constant 0 : i32
    %104 = vector.broadcast %c0_i32_18 : i32 to vector<8x1xi32>
    %105 = arith.cmpi slt, %101, %104 : vector<8x1xi32>
    %c0_i32_19 = arith.constant 0 : i32
    %106 = arith.cmpi slt, %99, %c0_i32_19 : i32
    %107 = vector.broadcast %106 : i1 to vector<8x1xi1>
    %108 = vector.broadcast %107 : vector<8x1xi1> to vector<8x1xi1>
    %109 = arith.xori %105, %108 : vector<8x1xi1>
    %110 = arith.andi %109, %103 : vector<8x1xi1>
    %111 = vector.broadcast %99 : i32 to vector<8x1xi32>
    %112 = arith.addi %101, %111 : vector<8x1xi32>
    %113 = arith.select %110, %112, %101 : vector<8x1xi1>, vector<8x1xi32>
    %c1_i32_20 = arith.constant 1 : i32
    %114 = tpu.dynamic_rotate %96 by %c1_i32_20 dim 0 : vector<8x48xf32>, i32 -> vector<8x48xf32>
    %c1_i32_21 = arith.constant 1 : i32
    %115 = vector.broadcast %c1_i32_21 : i32 to vector<8x1xi32>
    %116 = arith.cmpi sge, %113, %115 : vector<8x1xi32>
    %117 = arith.addf %96, %114 : vector<8x48xf32>
    %118 = vector.shape_cast %116 : vector<8x1xi1> to vector<8x1xi1>
    %119 = vector.broadcast %118 : vector<8x1xi1> to vector<8x48xi1>
    %120 = arith.select %119, %117, %96 : vector<8x48xi1>, vector<8x48xf32>
    %c2_i32 = arith.constant 2 : i32
    %121 = tpu.dynamic_rotate %120 by %c2_i32 dim 0 : vector<8x48xf32>, i32 -> vector<8x48xf32>
    %c2_i32_22 = arith.constant 2 : i32
    %122 = vector.broadcast %c2_i32_22 : i32 to vector<8x1xi32>
    %123 = arith.cmpi sge, %113, %122 : vector<8x1xi32>
    %124 = arith.addf %120, %121 : vector<8x48xf32>
    %125 = vector.shape_cast %123 : vector<8x1xi1> to vector<8x1xi1>
    %126 = vector.broadcast %125 : vector<8x1xi1> to vector<8x48xi1>
    %127 = arith.select %126, %124, %120 : vector<8x48xi1>, vector<8x48xf32>
    %c4_i32 = arith.constant 4 : i32
    %128 = tpu.dynamic_rotate %127 by %c4_i32 dim 0 : vector<8x48xf32>, i32 -> vector<8x48xf32>
    %c4_i32_23 = arith.constant 4 : i32
    %129 = vector.broadcast %c4_i32_23 : i32 to vector<8x1xi32>
    %130 = arith.cmpi sge, %113, %129 : vector<8x1xi32>
    %131 = arith.addf %127, %128 : vector<8x48xf32>
    %132 = vector.shape_cast %130 : vector<8x1xi1> to vector<8x1xi1>
    %133 = vector.broadcast %132 : vector<8x1xi1> to vector<8x48xi1>
    %134 = arith.select %133, %131, %127 : vector<8x48xi1>, vector<8x48xf32>
    %c0_24 = arith.constant 0 : index
    %c0_25 = arith.constant 0 : index
    %135 = vector.load %arg7[%c0_24, %c0_25] : memref<1x48xf32, #tpu.memory_space<vmem>>, vector<1x48xf32>
    %136 = vector.broadcast %135 : vector<1x48xf32> to vector<8x48xf32>
    %137 = arith.mulf %9, %136 : vector<8x48xf32>
    %138 = arith.addf %134, %137 : vector<8x48xf32>
    %139 = arith.negf %11 : vector<8x48xf32>
    %140 = math.exp %139 : vector<8x48xf32>
    %cst_26 = arith.constant 1.000000e+00 : f32
    %141 = vector.broadcast %cst_26 : f32 to vector<8x48xf32>
    %142 = arith.addf %141, %140 : vector<8x48xf32>
    %143 = arith.divf %141, %142 : vector<8x48xf32>
    %144 = arith.mulf %11, %143 : vector<8x48xf32>
    %145 = arith.mulf %138, %144 : vector<8x48xf32>
    %146 = arith.truncf %145 : vector<8x48xf32> to vector<8x48xbf16>
    %c0_27 = arith.constant 0 : index
    %c0_28 = arith.constant 0 : index
    %147 = vector.load %arg8[%c0_27, %c0_28] : memref<48x32xbf16, #tpu.memory_space<vmem>>, vector<48x32xbf16>
    %cst_29 = arith.constant dense<0.000000e+00> : vector<8x32xf32>
    %148 = tpu.matmul %146, %147, %cst_29 {dimension_numbers = #tpu.dot_dimension_numbers<[1], [0], [0], [1], [0, 0, 1, 1], [], []>} : vector<8x48xbf16>, vector<48x32xbf16>, vector<8x32xf32> -> vector<8x32xf32>
    %149 = arith.addf %0, %148 : vector<8x32xf32>
    %cst_30 = arith.constant dense<0.000000e+00> : vector<8xf32>
    %150 = vector.multi_reduction <add>, %149, %cst_30 [1] : vector<8x32xf32> to vector<8xf32>
    %151 = vector.shape_cast %150 : vector<8xf32> to vector<8x1xf32>
    %cst_31 = arith.constant 3.200000e+01 : f32
    %152 = vector.broadcast %cst_31 : f32 to vector<8x1xf32>
    %153 = arith.divf %151, %152 : vector<8x1xf32>
    %154 = vector.broadcast %153 : vector<8x1xf32> to vector<8x32xf32>
    %155 = arith.subf %149, %154 : vector<8x32xf32>
    %156 = arith.mulf %155, %155 : vector<8x32xf32>
    %cst_32 = arith.constant dense<0.000000e+00> : vector<8xf32>
    %157 = vector.multi_reduction <add>, %156, %cst_32 [1] : vector<8x32xf32> to vector<8xf32>
    %158 = vector.shape_cast %157 : vector<8xf32> to vector<8x1xf32>
    %cst_33 = arith.constant 3.200000e+01 : f32
    %159 = vector.broadcast %cst_33 : f32 to vector<8x1xf32>
    %160 = arith.divf %158, %159 : vector<8x1xf32>
    %161 = vector.broadcast %153 : vector<8x1xf32> to vector<8x32xf32>
    %162 = arith.subf %149, %161 : vector<8x32xf32>
    %cst_34 = arith.constant 9.99999974E-6 : f32
    %163 = vector.broadcast %cst_34 : f32 to vector<8x1xf32>
    %164 = arith.addf %160, %163 : vector<8x1xf32>
    %165 = math.sqrt %164 : vector<8x1xf32>
    %166 = vector.broadcast %165 : vector<8x1xf32> to vector<8x32xf32>
    %167 = arith.divf %162, %166 : vector<8x32xf32>
    %c0_35 = arith.constant 0 : index
    %c0_36 = arith.constant 0 : index
    %168 = vector.load %arg9[%c0_35, %c0_36] : memref<1x32xf32, #tpu.memory_space<vmem>>, vector<1x32xf32>
    %169 = vector.broadcast %168 : vector<1x32xf32> to vector<8x32xf32>
    %170 = arith.mulf %167, %169 : vector<8x32xf32>
    %c0_37 = arith.constant 0 : index
    %c0_38 = arith.constant 0 : index
    %171 = vector.load %arg10[%c0_37, %c0_38] : memref<1x32xf32, #tpu.memory_space<vmem>>, vector<1x32xf32>
    %172 = vector.broadcast %171 : vector<1x32xf32> to vector<8x32xf32>
    %173 = arith.addf %170, %172 : vector<8x32xf32>
    %174 = arith.truncf %173 : vector<8x32xf32> to vector<8x32xbf16>
    %c0_39 = arith.constant 0 : index
    %c0_40 = arith.constant 0 : index
    %175 = vector.load %arg11[%c0_39, %c0_40] : memref<32x64xbf16, #tpu.memory_space<vmem>>, vector<32x64xbf16>
    %cst_41 = arith.constant dense<0.000000e+00> : vector<8x64xf32>
    %176 = tpu.matmul %174, %175, %cst_41 {dimension_numbers = #tpu.dot_dimension_numbers<[1], [0], [0], [1], [0, 0, 1, 1], [], []>} : vector<8x32xbf16>, vector<32x64xbf16>, vector<8x64xf32> -> vector<8x64xf32>
    %c0_42 = arith.constant 0 : index
    %c0_43 = arith.constant 0 : index
    %177 = vector.load %arg12[%c0_42, %c0_43] : memref<1x64xf32, #tpu.memory_space<vmem>>, vector<1x64xf32>
    %178 = vector.broadcast %177 : vector<1x64xf32> to vector<8x64xf32>
    %179 = arith.addf %176, %178 : vector<8x64xf32>
    %cst_44 = arith.constant 5.000000e-01 : f32
    %180 = vector.broadcast %cst_44 : f32 to vector<8x64xf32>
    %181 = arith.mulf %180, %179 : vector<8x64xf32>
    %cst_45 = arith.constant 2.000000e+00 : f32
    %182 = math.sqrt %cst_45 : f32
    %183 = vector.broadcast %182 : f32 to vector<8x64xf32>
    %184 = arith.divf %179, %183 : vector<8x64xf32>
    %185 = math.erf %184 : vector<8x64xf32>
    %cst_46 = arith.constant 1.000000e+00 : f32
    %186 = vector.broadcast %cst_46 : f32 to vector<8x64xf32>
    %187 = arith.addf %186, %185 : vector<8x64xf32>
    %188 = arith.mulf %181, %187 : vector<8x64xf32>
    %189 = arith.truncf %188 : vector<8x64xf32> to vector<8x64xbf16>
    %c0_47 = arith.constant 0 : index
    %c0_48 = arith.constant 0 : index
    %190 = vector.load %arg13[%c0_47, %c0_48] : memref<64x32xbf16, #tpu.memory_space<vmem>>, vector<64x32xbf16>
    %cst_49 = arith.constant dense<0.000000e+00> : vector<8x32xf32>
    %191 = tpu.matmul %189, %190, %cst_49 {dimension_numbers = #tpu.dot_dimension_numbers<[1], [0], [0], [1], [0, 0, 1, 1], [], []>} : vector<8x64xbf16>, vector<64x32xbf16>, vector<8x32xf32> -> vector<8x32xf32>
    %c0_50 = arith.constant 0 : index
    %c0_51 = arith.constant 0 : index
    %192 = vector.load %arg14[%c0_50, %c0_51] : memref<1x32xf32, #tpu.memory_space<vmem>>, vector<1x32xf32>
    %193 = vector.broadcast %192 : vector<1x32xf32> to vector<8x32xf32>
    %194 = arith.addf %191, %193 : vector<8x32xf32>
    %195 = arith.addf %149, %194 : vector<8x32xf32>
    %c0_52 = arith.constant 0 : index
    %c0_53 = arith.constant 0 : index
    %196 = vector.load %arg15[%c0_52, %c0_53] : memref<8x32xf32, #tpu.memory_space<vmem>>, vector<8x32xf32>
    tpu.vector_store %arg15[%c0_52, %c0_53], %195 {strides = array<i32>} : memref<8x32xf32, #tpu.memory_space<vmem>>, vector<8x32xf32>,
    return
  }
  func.func @transform_0(%arg0: i32) -> (i32, i32) {
    %c0_i32 = arith.constant 0 : i32
    %c0_i32_0 = arith.constant 0 : i32
    return %arg0, %c0_i32 : i32, i32
  }
  func.func @transform_1(%arg0: i32) -> (i32, i32) {
    %c0_i32 = arith.constant 0 : i32
    %c0_i32_0 = arith.constant 0 : i32
    %c0_i32_1 = arith.constant 0 : i32
    return %c0_i32, %c0_i32_0 : i32, i32
  }
  func.func @transform_2(%arg0: i32) -> (i32, i32) {
    %c0_i32 = arith.constant 0 : i32
    %c0_i32_0 = arith.constant 0 : i32
    %c0_i32_1 = arith.constant 0 : i32
    return %c0_i32, %c0_i32_0 : i32, i32
  }
  func.func @transform_3(%arg0: i32) -> (i32, i32) {
    %c0_i32 = arith.constant 0 : i32
    %c0_i32_0 = arith.constant 0 : i32
    %c0_i32_1 = arith.constant 0 : i32
    return %c0_i32, %c0_i32_0 : i32, i32
  }
  func.func @transform_4(%arg0: i32) -> (i32, i32) {
    %c0_i32 = arith.constant 0 : i32
    %c0_i32_0 = arith.constant 0 : i32
    %c0_i32_1 = arith.constant 0 : i32
    return %c0_i32, %c0_i32_0 : i32, i32
  }
  func.func @transform_5(%arg0: i32) -> (i32, i32) {
    %c0_i32 = arith.constant 0 : i32
    %c0_i32_0 = arith.constant 0 : i32
    %c0_i32_1 = arith.constant 0 : i32
    return %c0_i32, %c0_i32_0 : i32, i32
  }
  func.func @transform_6(%arg0: i32) -> (i32, i32) {
    %c0_i32 = arith.constant 0 : i32
    %c0_i32_0 = arith.constant 0 : i32
    %c0_i32_1 = arith.constant 0 : i32
    return %c0_i32, %c0_i32_0 : i32, i32
  }
  func.func @transform_7(%arg0: i32) -> (i32, i32) {
    %c0_i32 = arith.constant 0 : i32
    %c0_i32_0 = arith.constant 0 : i32
    %c0_i32_1 = arith.constant 0 : i32
    return %c0_i32, %c0_i32_0 : i32, i32
  }
  func.func @transform_8(%arg0: i32) -> (i32, i32) {
    %c0_i32 = arith.constant 0 : i32
    %c0_i32_0 = arith.constant 0 : i32
    %c0_i32_1 = arith.constant 0 : i32
    return %c0_i32, %c0_i32_0 : i32, i32
  }
  func.func @transform_9(%arg0: i32) -> (i32, i32) {
    %c0_i32 = arith.constant 0 : i32
    %c0_i32_0 = arith.constant 0 : i32
    %c0_i32_1 = arith.constant 0 : i32
    return %c0_i32, %c0_i32_0 : i32, i32
  }
  func.func @transform_10(%arg0: i32) -> (i32, i32) {
    %c0_i32 = arith.constant 0 : i32
    %c0_i32_0 = arith.constant 0 : i32
    %c0_i32_1 = arith.constant 0 : i32
    return %c0_i32, %c0_i32_0 : i32, i32
  }
  func.func @transform_11(%arg0: i32) -> (i32, i32) {
    %c0_i32 = arith.constant 0 : i32
    %c0_i32_0 = arith.constant 0 : i32
    %c0_i32_1 = arith.constant 0 : i32
    return %c0_i32, %c0_i32_0 : i32, i32
  }
  func.func @transform_12(%arg0: i32) -> (i32, i32) {
    %c0_i32 = arith.constant 0 : i32
    %c0_i32_0 = arith.constant 0 : i32
    %c0_i32_1 = arith.constant 0 : i32
    return %c0_i32, %c0_i32_0 : i32, i32
  }
  func.func @transform_13(%arg0: i32) -> (i32, i32) {
    %c0_i32 = arith.constant 0 : i32
    %c0_i32_0 = arith.constant 0 : i32
    %c0_i32_1 = arith.constant 0 : i32
    return %c0_i32, %c0_i32_0 : i32, i32
  }
  func.func @transform_14(%arg0: i32) -> (i32, i32) {
    %c0_i32 = arith.constant 0 : i32
    %c0_i32_0 = arith.constant 0 : i32
    return %arg0, %c0_i32 : i32, i32
  }
}

module attributes {stable_mosaic.version = 11 : i64} {
  func.func @mamba_block_kernel(%arg0: i32, %arg1: memref<8x32xf32, #tpu.memory_space<vmem>>, %arg2: memref<32x48xbf16, #tpu.memory_space<vmem>>, %arg3: memref<32x48xbf16, #tpu.memory_space<vmem>>, %arg4: memref<48x8xbf16, #tpu.memory_space<vmem>>, %arg5: memref<1x8xf32, #tpu.memory_space<vmem>>, %arg6: memref<8x48xf32, #tpu.memory_space<vmem>>, %arg7: memref<1x48xf32, #tpu.memory_space<vmem>>, %arg8: memref<48x32xbf16, #tpu.memory_space<vmem>>, %arg9: memref<1x32xf32, #tpu.memory_space<vmem>>, %arg10: memref<1x32xf32, #tpu.memory_space<vmem>>, %arg11: memref<32x64xbf16, #tpu.memory_space<vmem>>, %arg12: memref<1x64xf32, #tpu.memory_space<vmem>>, %arg13: memref<64x32xbf16, #tpu.memory_space<vmem>>, %arg14: memref<1x32xf32, #tpu.memory_space<vmem>>, %arg15: memref<8x32xf32, #tpu.memory_space<vmem>>) attributes {dimension_semantics = [#tpu.dimension_semantics<parallel>], iteration_bounds = array<i64: 2>, scalar_prefetch = 0 : i64, scratch_operands = 0 : i64, tpu.core_type = #tpu.core_type<tc>, window_params = [{transform_indices = @transform_0, window_bounds = array<i64: 8, 32>}, {pipeline_mode = #tpu.pipeline_mode<synchronous>, transform_indices = @transform_1, window_bounds = array<i64: 32, 48>}, {pipeline_mode = #tpu.pipeline_mode<synchronous>, transform_indices = @transform_2, window_bounds = array<i64: 32, 48>}, {pipeline_mode = #tpu.pipeline_mode<synchronous>, transform_indices = @transform_3, window_bounds = array<i64: 48, 8>}, {pipeline_mode = #tpu.pipeline_mode<synchronous>, transform_indices = @transform_4, window_bounds = array<i64: 1, 8>}, {pipeline_mode = #tpu.pipeline_mode<synchronous>, transform_indices = @transform_5, window_bounds = array<i64: 8, 48>}, {pipeline_mode = #tpu.pipeline_mode<synchronous>, transform_indices = @transform_6, window_bounds = array<i64: 1, 48>}, {pipeline_mode = #tpu.pipeline_mode<synchronous>, transform_indices = @transform_7, window_bounds = array<i64: 48, 32>}, {pipeline_mode = #tpu.pipeline_mode<synchronous>, transform_indices = @transform_8, window_bounds = array<i64: 1, 32>}, {pipeline_mode = #tpu.pipeline_mode<synchronous>, transform_indices = @transform_9, window_bounds = array<i64: 1, 32>}, {pipeline_mode = #tpu.pipeline_mode<synchronous>, transform_indices = @transform_10, window_bounds = array<i64: 32, 64>}, {pipeline_mode = #tpu.pipeline_mode<synchronous>, transform_indices = @transform_11, window_bounds = array<i64: 1, 64>}, {pipeline_mode = #tpu.pipeline_mode<synchronous>, transform_indices = @transform_12, window_bounds = array<i64: 64, 32>}, {pipeline_mode = #tpu.pipeline_mode<synchronous>, transform_indices = @transform_13, window_bounds = array<i64: 1, 32>}, {transform_indices = @transform_14, window_bounds = array<i64: 8, 32>}]} {
    %c0 = arith.constant 0 : index
    %c0_0 = arith.constant 0 : index
    %0 = vector.load %arg1[%c0, %c0_0] : memref<8x32xf32, #tpu.memory_space<vmem>>, vector<8x32xf32>
    %1 = arith.truncf %0 : vector<8x32xf32> to vector<8x32xbf16>
    %c0_1 = arith.constant 0 : index
    %c0_2 = arith.constant 0 : index
    %2 = vector.load %arg2[%c0_1, %c0_2] : memref<32x48xbf16, #tpu.memory_space<vmem>>, vector<32x48xbf16>
    %cst = arith.constant dense<0.000000e+00> : vector<8x48xf32>
    %3 = tpu.matmul %1, %2, %cst {dimension_numbers = #tpu.dot_dimension_numbers<[1], [0], [0], [1], [0, 0, 1, 1], [], []>} : vector<8x32xbf16>, vector<32x48xbf16>, vector<8x48xf32> -> vector<8x48xf32>
    %4 = arith.negf %3 : vector<8x48xf32>
    %5 = math.exp %4 : vector<8x48xf32>
    %cst_3 = arith.constant 1.000000e+00 : f32
    %6 = vector.broadcast %cst_3 : f32 to vector<8x48xf32>
    %7 = arith.addf %6, %5 : vector<8x48xf32>
    %8 = arith.divf %6, %7 : vector<8x48xf32>
    %9 = arith.mulf %3, %8 : vector<8x48xf32>
    %c0_4 = arith.constant 0 : index
    %c0_5 = arith.constant 0 : index
    %10 = vector.load %arg3[%c0_4, %c0_5] : memref<32x48xbf16, #tpu.memory_space<vmem>>, vector<32x48xbf16>
    %cst_6 = arith.constant dense<0.000000e+00> : vector<8x48xf32>
    %11 = tpu.matmul %1, %10, %cst_6 {dimension_numbers = #tpu.dot_dimension_numbers<[1], [0], [0], [1], [0, 0, 1, 1], [], []>} : vector<8x32xbf16>, vector<32x48xbf16>, vector<8x48xf32> -> vector<8x48xf32>
    %12 = arith.truncf %9 : vector<8x48xf32> to vector<8x48xbf16>
    %c0_7 = arith.constant 0 : index
    %c0_8 = arith.constant 0 : index
    %13 = vector.load %arg4[%c0_7, %c0_8] : memref<48x8xbf16, #tpu.memory_space<vmem>>, vector<48x8xbf16>
    %cst_9 = arith.constant dense<0.000000e+00> : vector<8x8xf32>
    %14 = tpu.matmul %12, %13, %cst_9 {dimension_numbers = #tpu.dot_dimension_numbers<[1], [0], [0], [1], [0, 0, 1, 1], [], []>} : vector<8x48xbf16>, vector<48x8xbf16>, vector<8x8xf32> -> vector<8x8xf32>
    %c0_10 = arith.constant 0 : index
    %c0_11 = arith.constant 0 : index
    %15 = vector.load %arg5[%c0_10, %c0_11] : memref<1x8xf32, #tpu.memory_space<vmem>>, vector<1x8xf32>
    %16 = vector.broadcast %15 : vector<1x8xf32> to vector<8x8xf32>
    %17 = arith.addf %14, %16 : vector<8x8xf32>
    %cst_12 = arith.constant 1.000000e-03 : f32
    %cst_13 = arith.constant 1.000000e-01 : f32
    %18 = vector.broadcast %cst_12 : f32 to vector<8x8xf32>
    %19 = arith.maximumf %18, %17 : vector<8x8xf32>
    %20 = vector.broadcast %cst_13 : f32 to vector<8x8xf32>
    %21 = arith.minimumf %20, %19 : vector<8x8xf32>
    %c0_14 = arith.constant 0 : index
    %c0_15 = arith.constant 0 : index
    %22 = vector.load %arg6[%c0_14, %c0_15] : memref<8x48xf32, #tpu.memory_space<vmem>>, vector<8x48xf32>
    %cst_16 = arith.constant 0.000000e+00 : f32
    %23 = vector.broadcast %cst_16 : f32 to vector<8x48xf32>
    %24 = vector.extract_strided_slice %21 {offsets = [0, 0], sizes = [8, 1], strides = [1, 1]} : vector<8x8xf32> to vector<8x1xf32>
    %25 = vector.extract_strided_slice %22 {offsets = [0, 0], sizes = [1, 48], strides = [1, 1]} : vector<8x48xf32> to vector<1x48xf32>
    %26 = vector.broadcast %24 : vector<8x1xf32> to vector<8x48xf32>
    %27 = vector.broadcast %25 : vector<1x48xf32> to vector<8x48xf32>
    %28 = arith.mulf %26, %27 : vector<8x48xf32>
    %29 = math.exp %28 : vector<8x48xf32>
    %30 = vector.broadcast %24 : vector<8x1xf32> to vector<8x48xf32>
    %31 = arith.mulf %30, %29 : vector<8x48xf32>
    %32 = arith.addf %23, %31 : vector<8x48xf32>
    %33 = vector.extract_strided_slice %21 {offsets = [0, 1], sizes = [8, 1], strides = [1, 1]} : vector<8x8xf32> to vector<8x1xf32>
    %34 = vector.extract_strided_slice %22 {offsets = [1, 0], sizes = [1, 48], strides = [1, 1]} : vector<8x48xf32> to vector<1x48xf32>
    %35 = vector.broadcast %33 : vector<8x1xf32> to vector<8x48xf32>
    %36 = vector.broadcast %34 : vector<1x48xf32> to vector<8x48xf32>
    %37 = arith.mulf %35, %36 : vector<8x48xf32>
    %38 = math.exp %37 : vector<8x48xf32>
    %39 = vector.broadcast %33 : vector<8x1xf32> to vector<8x48xf32>
    %40 = arith.mulf %39, %38 : vector<8x48xf32>
    %41 = arith.addf %32, %40 : vector<8x48xf32>
    %42 = vector.extract_strided_slice %21 {offsets = [0, 2], sizes = [8, 1], strides = [1, 1]} : vector<8x8xf32> to vector<8x1xf32>
    %43 = vector.extract_strided_slice %22 {offsets = [2, 0], sizes = [1, 48], strides = [1, 1]} : vector<8x48xf32> to vector<1x48xf32>
    %44 = vector.broadcast %42 : vector<8x1xf32> to vector<8x48xf32>
    %45 = vector.broadcast %43 : vector<1x48xf32> to vector<8x48xf32>
    %46 = arith.mulf %44, %45 : vector<8x48xf32>
    %47 = math.exp %46 : vector<8x48xf32>
    %48 = vector.broadcast %42 : vector<8x1xf32> to vector<8x48xf32>
    %49 = arith.mulf %48, %47 : vector<8x48xf32>
    %50 = arith.addf %41, %49 : vector<8x48xf32>
    %51 = vector.extract_strided_slice %21 {offsets = [0, 3], sizes = [8, 1], strides = [1, 1]} : vector<8x8xf32> to vector<8x1xf32>
    %52 = vector.extract_strided_slice %22 {offsets = [3, 0], sizes = [1, 48], strides = [1, 1]} : vector<8x48xf32> to vector<1x48xf32>
    %53 = vector.broadcast %51 : vector<8x1xf32> to vector<8x48xf32>
    %54 = vector.broadcast %52 : vector<1x48xf32> to vector<8x48xf32>
    %55 = arith.mulf %53, %54 : vector<8x48xf32>
    %56 = math.exp %55 : vector<8x48xf32>
    %57 = vector.broadcast %51 : vector<8x1xf32> to vector<8x48xf32>
    %58 = arith.mulf %57, %56 : vector<8x48xf32>
    %59 = arith.addf %50, %58 : vector<8x48xf32>
    %60 = vector.extract_strided_slice %21 {offsets = [0, 4], sizes = [8, 1], strides = [1, 1]} : vector<8x8xf32> to vector<8x1xf32>
    %61 = vector.extract_strided_slice %22 {offsets = [4, 0], sizes = [1, 48], strides = [1, 1]} : vector<8x48xf32> to vector<1x48xf32>
    %62 = vector.broadcast %60 : vector<8x1xf32> to vector<8x48xf32>
    %63 = vector.broadcast %61 : vector<1x48xf32> to vector<8x48xf32>
    %64 = arith.mulf %62, %63 : vector<8x48xf32>
    %65 = math.exp %64 : vector<8x48xf32>
    %66 = vector.broadcast %60 : vector<8x1xf32> to vector<8x48xf32>
    %67 = arith.mulf %66, %65 : vector<8x48xf32>
    %68 = arith.addf %59, %67 : vector<8x48xf32>
    %69 = vector.extract_strided_slice %21 {offsets = [0, 5], sizes = [8, 1], strides = [1, 1]} : vector<8x8xf32> to vector<8x1xf32>
    %70 = vector.extract_strided_slice %22 {offsets = [5, 0], sizes = [1, 48], strides = [1, 1]} : vector<8x48xf32> to vector<1x48xf32>
    %71 = vector.broadcast %69 : vector<8x1xf32> to vector<8x48xf32>
    %72 = vector.broadcast %70 : vector<1x48xf32> to vector<8x48xf32>
    %73 = arith.mulf %71, %72 : vector<8x48xf32>
    %74 = math.exp %73 : vector<8x48xf32>
    %75 = vector.broadcast %69 : vector<8x1xf32> to vector<8x48xf32>
    %76 = arith.mulf %75, %74 : vector<8x48xf32>
    %77 = arith.addf %68, %76 : vector<8x48xf32>
    %78 = vector.extract_strided_slice %21 {offsets = [0, 6], sizes = [8, 1], strides = [1, 1]} : vector<8x8xf32> to vector<8x1xf32>
    %79 = vector.extract_strided_slice %22 {offsets = [6, 0], sizes = [1, 48], strides = [1, 1]} : vector<8x48xf32> to vector<1x48xf32>
    %80 = vector.broadcast %78 : vector<8x1xf32> to vector<8x48xf32>
    %81 = vector.broadcast %79 : vector<1x48xf32> to vector<8x48xf32>
    %82 = arith.mulf %80, %81 : vector<8x48xf32>
    %83 = math.exp %82 : vector<8x48xf32>
    %84 = vector.broadcast %78 : vector<8x1xf32> to vector<8x48xf32>
    %85 = arith.mulf %84, %83 : vector<8x48xf32>
    %86 = arith.addf %77, %85 : vector<8x48xf32>
    %87 = vector.extract_strided_slice %21 {offsets = [0, 7], sizes = [8, 1], strides = [1, 1]} : vector<8x8xf32> to vector<8x1xf32>
    %88 = vector.extract_strided_slice %22 {offsets = [7, 0], sizes = [1, 48], strides = [1, 1]} : vector<8x48xf32> to vector<1x48xf32>
    %89 = vector.broadcast %87 : vector<8x1xf32> to vector<8x48xf32>
    %90 = vector.broadcast %88 : vector<1x48xf32> to vector<8x48xf32>
    %91 = arith.mulf %89, %90 : vector<8x48xf32>
    %92 = math.exp %91 : vector<8x48xf32>
    %93 = vector.broadcast %87 : vector<8x1xf32> to vector<8x48xf32>
    %94 = arith.mulf %93, %92 : vector<8x48xf32>
    %95 = arith.addf %86, %94 : vector<8x48xf32>
    %96 = arith.mulf %9, %95 : vector<8x48xf32>
    %97 = tpu.iota {dimensions = array<i32: 0>} : vector<8x1xi32>
    %c8_i32 = arith.constant 8 : i32
    %c0_i32 = arith.constant 0 : i32
    %98 = arith.cmpi eq, %c8_i32, %c0_i32 : i32
    %c1_i32 = arith.constant 1 : i32
    %99 = arith.select %98, %c1_i32, %c8_i32 : i32
    %100 = vector.broadcast %99 : i32 to vector<8x1xi32>
    %101 = arith.remsi %97, %100 : vector<8x1xi32>
    %c0_i32_17 = arith.constant 0 : i32
    %102 = vector.broadcast %c0_i32_17 : i32 to vector<8x1xi32>
    %103 = arith.cmpi ne, %101, %102 : vector<8x1xi32>
    %c0_i32_18 = arith.constant 0 : i32
    %104 = vector.broadcast %c0_i32_18 : i32 to vector<8x1xi32>
    %105 = arith.cmpi slt, %101, %104 : vector<8x1xi32>
    %c0_i32_19 = arith.constant 0 : i32
    %106 = arith.cmpi slt, %99, %c0_i32_19 : i32
    %107 = vector.broadcast %106 : i1 to vector<8x1xi1>
    %108 = vector.broadcast %107 : vector<8x1xi1> to vector<8x1xi1>
    %109 = arith.xori %105, %108 : vector<8x1xi1>
    %110 = arith.andi %109, %103 : vector<8x1xi1>
    %111 = vector.broadcast %99 : i32 to vector<8x1xi32>
    %112 = arith.addi %101, %111 : vector<8x1xi32>
    %113 = arith.select %110, %112, %101 : vector<8x1xi1>, vector<8x1xi32>
    %c1_i32_20 = arith.constant 1 : i32
    %114 = tpu.dynamic_rotate %96 by %c1_i32_20 dim 0 : vector<8x48xf32>, i32 -> vector<8x48xf32>
    %c1_i32_21 = arith.constant 1 : i32
    %115 = vector.broadcast %c1_i32_21 : i32 to vector<8x1xi32>
    %116 = arith.cmpi sge, %113, %115 : vector<8x1xi32>
    %117 = arith.addf %96, %114 : vector<8x48xf32>
    %118 = vector.shape_cast %116 : vector<8x1xi1> to vector<8x1xi1>
    %119 = vector.broadcast %118 : vector<8x1xi1> to vector<8x48xi1>
    %120 = arith.select %119, %117, %96 : vector<8x48xi1>, vector<8x48xf32>
    %c2_i32 = arith.constant 2 : i32
    %121 = tpu.dynamic_rotate %120 by %c2_i32 dim 0 : vector<8x48xf32>, i32 -> vector<8x48xf32>
    %c2_i32_22 = arith.constant 2 : i32
    %122 = vector.broadcast %c2_i32_22 : i32 to vector<8x1xi32>
    %123 = arith.cmpi sge, %113, %122 : vector<8x1xi32>
    %124 = arith.addf %120, %121 : vector<8x48xf32>
    %125 = vector.shape_cast %123 : vector<8x1xi1> to vector<8x1xi1>
    %126 = vector.broadcast %125 : vector<8x1xi1> to vector<8x48xi1>
    %127 = arith.select %126, %124, %120 : vector<8x48xi1>, vector<8x48xf32>
    %c4_i32 = arith.constant 4 : i32
    %128 = tpu.dynamic_rotate %127 by %c4_i32 dim 0 : vector<8x48xf32>, i32 -> vector<8x48xf32>
    %c4_i32_23 = arith.constant 4 : i32
    %129 = vector.broadcast %c4_i32_23 : i32 to vector<8x1xi32>
    %130 = arith.cmpi sge, %113, %129 : vector<8x1xi32>
    %131 = arith.addf %127, %128 : vector<8x48xf32>
    %132 = vector.shape_cast %130 : vector<8x1xi1> to vector<8x1xi1>
    %133 = vector.broadcast %132 : vector<8x1xi1> to vector<8x48xi1>
    %134 = arith.select %133, %131, %127 : vector<8x48xi1>, vector<8x48xf32>
    %c0_24 = arith.constant 0 : index
    %c0_25 = arith.constant 0 : index
    %135 = vector.load %arg7[%c0_24, %c0_25] : memref<1x48xf32, #tpu.memory_space<vmem>>, vector<1x48xf32>
    %136 = vector.broadcast %135 : vector<1x48xf32> to vector<8x48xf32>
    %137 = arith.mulf %9, %136 : vector<8x48xf32>
    %138 = arith.addf %134, %137 : vector<8x48xf32>
    %139 = arith.negf %11 : vector<8x48xf32>
    %140 = math.exp %139 : vector<8x48xf32>
    %cst_26 = arith.constant 1.000000e+00 : f32
    %141 = vector.broadcast %cst_26 : f32 to vector<8x48xf32>
    %142 = arith.addf %141, %140 : vector<8x48xf32>
    %143 = arith.divf %141, %142 : vector<8x48xf32>
    %144 = arith.mulf %11, %143 : vector<8x48xf32>
    %145 = arith.mulf %138, %144 : vector<8x48xf32>
    %146 = arith.truncf %145 : vector<8x48xf32> to vector<8x48xbf16>
    %c0_27 = arith.constant 0 : index
    %c0_28 = arith.constant 0 : index
    %147 = vector.load %arg8[%c0_27, %c0_28] : memref<48x32xbf16, #tpu.memory_space<vmem>>, vector<48x32xbf16>
    %cst_29 = arith.constant dense<0.000000e+00> : vector<8x32xf32>
    %148 = tpu.matmul %146, %147, %cst_29 {dimension_numbers = #tpu.dot_dimension_numbers<[1], [0], [0], [1], [0, 0, 1, 1], [], []>} : vector<8x48xbf16>, vector<48x32xbf16>, vector<8x32xf32> -> vector<8x32xf32>
    %149 = arith.addf %0, %148 : vector<8x32xf32>
    %cst_30 = arith.constant dense<0.000000e+00> : vector<8xf32>
    %150 = vector.multi_reduction <add>, %149, %cst_30 [1] : vector<8x32xf32> to vector<8xf32>
    %151 = vector.shape_cast %150 : vector<8xf32> to vector<8x1xf32>
    %cst_31 = arith.constant 3.200000e+01 : f32
    %152 = vector.broadcast %cst_31 : f32 to vector<8x1xf32>
    %153 = arith.divf %151, %152 : vector<8x1xf32>
    %154 = vector.broadcast %153 : vector<8x1xf32> to vector<8x32xf32>
    %155 = arith.subf %149, %154 : vector<8x32xf32>
    %156 = arith.mulf %155, %155 : vector<8x32xf32>
    %cst_32 = arith.constant dense<0.000000e+00> : vector<8xf32>
    %157 = vector.multi_reduction <add>, %156, %cst_32 [1] : vector<8x32xf32> to vector<8xf32>
    %158 = vector.shape_cast %157 : vector<8xf32> to vector<8x1xf32>
    %cst_33 = arith.constant 3.200000e+01 : f32
    %159 = vector.broadcast %cst_33 : f32 to vector<8x1xf32>
    %160 = arith.divf %158, %159 : vector<8x1xf32>
    %161 = vector.broadcast %153 : vector<8x1xf32> to vector<8x32xf32>
    %162 = arith.subf %149, %161 : vector<8x32xf32>
    %cst_34 = arith.constant 9.99999974E-6 : f32
    %163 = vector.broadcast %cst_34 : f32 to vector<8x1xf32>
    %164 = arith.addf %160, %163 : vector<8x1xf32>
    %165 = math.sqrt %164 : vector<8x1xf32>
    %166 = vector.broadcast %165 : vector<8x1xf32> to vector<8x32xf32>
    %167 = arith.divf %162, %166 : vector<8x32xf32>
    %c0_35 = arith.constant 0 : index
    %c0_36 = arith.constant 0 : index
    %168 = vector.load %arg9[%c0_35, %c0_36] : memref<1x32xf32, #tpu.memory_space<vmem>>, vector<1x32xf32>
    %169 = vector.broadcast %168 : vector<1x32xf32> to vector<8x32xf32>
    %170 = arith.mulf %167, %169 : vector<8x32xf32>
    %c0_37 = arith.constant 0 : index
    %c0_38 = arith.constant 0 : index
    %171 = vector.load %arg10[%c0_37, %c0_38] : memref<1x32xf32, #tpu.memory_space<vmem>>, vector<1x32xf32>
    %172 = vector.broadcast %171 : vector<1x32xf32> to vector<8x32xf32>
    %173 = arith.addf %170, %172 : vector<8x32xf32>
    %174 = arith.truncf %173 : vector<8x32xf32> to vector<8x32xbf16>
    %c0_39 = arith.constant 0 : index
    %c0_40 = arith.constant 0 : index
    %175 = vector.load %arg11[%c0_39, %c0_40] : memref<32x64xbf16, #tpu.memory_space<vmem>>, vector<32x64xbf16>
    %cst_41 = arith.constant dense<0.000000e+00> : vector<8x64xf32>
    %176 = tpu.matmul %174, %175, %cst_41 {dimension_numbers = #tpu.dot_dimension_numbers<[1], [0], [0], [1], [0, 0, 1, 1], [], []>} : vector<8x32xbf16>, vector<32x64xbf16>, vector<8x64xf32> -> vector<8x64xf32>
    %c0_42 = arith.constant 0 : index
    %c0_43 = arith.constant 0 : index
    %177 = vector.load %arg12[%c0_42, %c0_43] : memref<1x64xf32, #tpu.memory_space<vmem>>, vector<1x64xf32>
    %178 = vector.broadcast %177 : vector<1x64xf32> to vector<8x64xf32>
    %179 = arith.addf %176, %178 : vector<8x64xf32>
    %cst_44 = arith.constant 5.000000e-01 : f32
    %180 = vector.broadcast %cst_44 : f32 to vector<8x64xf32>
    %181 = arith.mulf %180, %179 : vector<8x64xf32>
    %cst_45 = arith.constant 2.000000e+00 : f32
    %182 = math.sqrt %cst_45 : f32
    %183 = vector.broadcast %182 : f32 to vector<8x64xf32>
    %184 = arith.divf %179, %183 : vector<8x64xf32>
    %185 = math.erf %184 : vector<8x64xf32>
    %cst_46 = arith.constant 1.000000e+00 : f32
    %186 = vector.broadcast %cst_46 : f32 to vector<8x64xf32>
    %187 = arith.addf %186, %185 : vector<8x64xf32>
    %188 = arith.mulf %181, %187 : vector<8x64xf32>
    %189 = arith.truncf %188 : vector<8x64xf32> to vector<8x64xbf16>
    %c0_47 = arith.constant 0 : index
    %c0_48 = arith.constant 0 : index
    %190 = vector.load %arg13[%c0_47, %c0_48] : memref<64x32xbf16, #tpu.memory_space<vmem>>, vector<64x32xbf16>
    %cst_49 = arith.constant dense<0.000000e+00> : vector<8x32xf32>
    %191 = tpu.matmul %189, %190, %cst_49 {dimension_numbers = #tpu.dot_dimension_numbers<[1], [0], [0], [1], [0, 0, 1, 1], [], []>} : vector<8x64xbf16>, vector<64x32xbf16>, vector<8x32xf32> -> vector<8x32xf32>
    %c0_50 = arith.constant 0 : index
    %c0_51 = arith.constant 0 : index
    %192 = vector.load %arg14[%c0_50, %c0_51] : memref<1x32xf32, #tpu.memory_space<vmem>>, vector<1x32xf32>
    %193 = vector.broadcast %192 : vector<1x32xf32> to vector<8x32xf32>
    %194 = arith.addf %191, %193 : vector<8x32xf32>
    %195 = arith.addf %149, %194 : vector<8x32xf32>
    %c0_52 = arith.constant 0 : index
    %c0_53 = arith.constant 0 : index
    %196 = vector.load %arg15[%c0_52, %c0_53] : memref<8x32xf32, #tpu.memory_space<vmem>>, vector<8x32xf32>
    tpu.vector_store %arg15[%c0_52, %c0_53], %195 {strides = array<i32>} : memref<8x32xf32, #tpu.memory_space<vmem>>, vector<8x32xf32>,
    return
  }
  func.func @transform_0(%arg0: i32) -> (i32, i32) {
    %c0_i32 = arith.constant 0 : i32
    %c0_i32_0 = arith.constant 0 : i32
    return %arg0, %c0_i32 : i32, i32
  }
  func.func @transform_1(%arg0: i32) -> (i32, i32) {
    %c0_i32 = arith.constant 0 : i32
    %c0_i32_0 = arith.constant 0 : i32
    %c0_i32_1 = arith.constant 0 : i32
    return %c0_i32, %c0_i32_0 : i32, i32
  }
  func.func @transform_2(%arg0: i32) -> (i32, i32) {
    %c0_i32 = arith.constant 0 : i32
    %c0_i32_0 = arith.constant 0 : i32
    %c0_i32_1 = arith.constant 0 : i32
    return %c0_i32, %c0_i32_0 : i32, i32
  }
  func.func @transform_3(%arg0: i32) -> (i32, i32) {
    %c0_i32 = arith.constant 0 : i32
    %c0_i32_0 = arith.constant 0 : i32
    %c0_i32_1 = arith.constant 0 : i32
    return %c0_i32, %c0_i32_0 : i32, i32
  }
  func.func @transform_4(%arg0: i32) -> (i32, i32) {
    %c0_i32 = arith.constant 0 : i32
    %c0_i32_0 = arith.constant 0 : i32
    %c0_i32_1 = arith.constant 0 : i32
    return %c0_i32, %c0_i32_0 : i32, i32
  }
  func.func @transform_5(%arg0: i32) -> (i32, i32) {
    %c0_i32 = arith.constant 0 : i32
    %c0_i32_0 = arith.constant 0 : i32
    %c0_i32_1 = arith.constant 0 : i32
    return %c0_i32, %c0_i32_0 : i32, i32
  }
  func.func @transform_6(%arg0: i32) -> (i32, i32) {
    %c0_i32 = arith.constant 0 : i32
    %c0_i32_0 = arith.constant 0 : i32
    %c0_i32_1 = arith.constant 0 : i32
    return %c0_i32, %c0_i32_0 : i32, i32
  }
  func.func @transform_7(%arg0: i32) -> (i32, i32) {
    %c0_i32 = arith.constant 0 : i32
    %c0_i32_0 = arith.constant 0 : i32
    %c0_i32_1 = arith.constant 0 : i32
    return %c0_i32, %c0_i32_0 : i32, i32
  }
  func.func @transform_8(%arg0: i32) -> (i32, i32) {
    %c0_i32 = arith.constant 0 : i32
    %c0_i32_0 = arith.constant 0 : i32
    %c0_i32_1 = arith.constant 0 : i32
    return %c0_i32, %c0_i32_0 : i32, i32
  }
  func.func @transform_9(%arg0: i32) -> (i32, i32) {
    %c0_i32 = arith.constant 0 : i32
    %c0_i32_0 = arith.constant 0 : i32
    %c0_i32_1 = arith.constant 0 : i32
    return %c0_i32, %c0_i32_0 : i32, i32
  }
  func.func @transform_10(%arg0: i32) -> (i32, i32) {
    %c0_i32 = arith.constant 0 : i32
    %c0_i32_0 = arith.constant 0 : i32
    %c0_i32_1 = arith.constant 0 : i32
    return %c0_i32, %c0_i32_0 : i32, i32
  }
  func.func @transform_11(%arg0: i32) -> (i32, i32) {
    %c0_i32 = arith.constant 0 : i32
    %c0_i32_0 = arith.constant 0 : i32
    %c0_i32_1 = arith.constant 0 : i32
    return %c0_i32, %c0_i32_0 : i32, i32
  }
  func.func @transform_12(%arg0: i32) -> (i32, i32) {
    %c0_i32 = arith.constant 0 : i32
    %c0_i32_0 = arith.constant 0 : i32
    %c0_i32_1 = arith.constant 0 : i32
    return %c0_i32, %c0_i32_0 : i32, i32
  }
  func.func @transform_13(%arg0: i32) -> (i32, i32) {
    %c0_i32 = arith.constant 0 : i32
    %c0_i32_0 = arith.constant 0 : i32
    %c0_i32_1 = arith.constant 0 : i32
    return %c0_i32, %c0_i32_0 : i32, i32
  }
  func.func @transform_14(%arg0: i32) -> (i32, i32) {
    %c0_i32 = arith.constant 0 : i32
    %c0_i32_0 = arith.constant 0 : i32
    return %arg0, %c0_i32 : i32, i32
  }
}

</mosaic_0001>

<bundles_post_ra>
// kernel: tpu_custom_call.1
= control target key start
LH: loop header
LB: loop body
LE: loop exit
PB: predicated region body
PF: predicated region fallthrough
CT: control target
= control target key end

     0   :  { %s1590_s0 = inlined_call_operand.vmem [shape: f32[16,32], index: 0, kind: input, shape index: {}]   ;;  %s1591_s1 = inlined_call_operand.vmem [shape: bf16[32,48], index: 1, kind: input, shape index: {}]   ;;  %s1592_s2 = inlined_call_operand.vmem [shape: bf16[32,48], index: 2, kind: input, shape index: {}]   ;;  %s1593_s3 = inlined_call_operand.vmem [shape: bf16[48,8], index: 3, kind: input, shape index: {}]   ;;  %s1594_s4 = inlined_call_operand.vmem [shape: f32[1,8], index: 4, kind: input, shape index: {}]   ;;  %s1595_s5 = inlined_call_operand.vmem [shape: f32[8,48], index: 5, kind: input, shape index: {}]   ;;  %s1596_s6 = inlined_call_operand.vmem [shape: f32[1,48], index: 6, kind: input, shape index: {}]   ;;  %s1597_s7 = inlined_call_operand.vmem [shape: bf16[48,32], index: 7, kind: input, shape index: {}]   ;;  %s1598_s8 = inlined_call_operand.vmem [shape: f32[1,32], index: 8, kind: input, shape index: {}]   ;;  %s1599_s9 = inlined_call_operand.vmem [shape: f32[1,32], index: 9, kind: input, shape index: {}]   ;;  %s1600_s10 = inlined_call_operand.vmem [shape: bf16[32,64], index: 10, kind: input, shape index: {}]   ;;  %s1601_s11 = inlined_call_operand.vmem [shape: f32[1,64], index: 11, kind: input, shape index: {}]   ;;  %s1602_s12 = inlined_call_operand.vmem [shape: bf16[64,32], index: 12, kind: input, shape index: {}]   ;;  %s1603_s13 = inlined_call_operand.vmem [shape: f32[1,32], index: 13, kind: input, shape index: {}]   ;;  %s1604_s14 = inlined_call_operand.hbm [shape: f32[16,32], index: 14, kind: output, shape index: {}]  }
   0x1   :  { %1606 = sst [smem:[#allocation7_spill]] %s1590_s0 }
   0x2   :  { %1607 = sst [smem:[#allocation8_spill]] %s1591_s1 }
   0x3   :  { %1608 = sst [smem:[#allocation9_spill]] %s1592_s2 }
   0x4   :  { %19 = vsyncpa [#allocation3], 0 }
   0x5   :  { %21 = vsyncpa [#allocation3 + $0x1], 0  ;;  %s1400_s29 = smov 0   ;;  %s1402_s30 = smov 0  }
   0x6   :  { %s1404_s15 = smov 0   ;;  %s1406_s16 = smov 0  }
   0x7 LB: > { %1609 = sst [smem:[#allocation5_spill]] %s1309_s15  ;;  %s1421_s17 = sadd.s32 4294967295, %s1313_s16   ;;  %s1313_s16 = sphi %s1406_s16, %s1620_s16   ;;  %s1309_s15 = sphi %s1404_s15, %s1617_s15   ;;  %s1305_s30 = sphi %s1402_s30, %s1619_s30   ;;  %s1301_s29 = sphi %s1400_s29, %s1618_s29  }
   0x8   : > { %s1054_s18 = sadd.s32 4294967294, %s1313_s16   ;;  %s1425_s19 = sadd.s32 1, %s1313_s16  }
   0x9   : > { %s333_s20 = sadd.s32 1, %s1309_s15  ;;  %s330_s21 = ssub.s32 %s1313_s16, %s1425_s19 }
   0xa   : > { %p343_p0 = scmp.ne.s32.totalorder %s1309_s15, %s1305_s30  ;;  %p331_p1 = scmp.eq.s32.totalorder %s330_s21, 0 }
   0xb   : > { %p344_p2 = scmp.eq.s32.totalorder %s1421_s17, 1  ;;  %p349_p3 = scmp.ne.s32.totalorder %s1305_s30, %s1301_s29 }
   0xc   : > { %p350_p4 = scmp.eq.s32.totalorder %s1054_s18, 1  ;;  %p1057_p7 = scmp.ge.s32.totalorder %s1313_s16, 1 }
   0xd   : > { %s1436_s22 = scalar_select %p331_p1, %s1309_s15, %s333_s20  }
   0xe   : > { %p1438_p5 = por %p344_p2, %p343_p0  ;;  %p1442_p6 = por %p350_p4, %p349_p3 }
   0xf   : > { %1610 = sst [smem:[#allocation6_spill]] %s1436_s22  ;;  %p414_p8 = scmp.lt.s32.totalorder %s1313_s16, 3 }
  0x11   : > { %p415_p9 = pnand %p1057_p7, %p414_p8 }
  0x12   : > { %s1613_s1 = sld [smem:[#allocation8_spill]] (!%p415_p9)  ;;  %p459_p10 = scmp.lt.s32.totalorder (!%p415_p9), %s1421_s17, 1 }
  0x13   : > { %418 = sbr.rel (%p415_p9) target bundleno = 1242 (0x4da), region = 76  ;;  %s1614_s0 = sld [smem:[#allocation7_spill]] (!%p415_p9) }
  0x14   : > { %s1615_s2 = sld [smem:[#allocation9_spill]] (!%p415_p9)  ;;  %s456_s22 = sand.u32 (!%p415_p9), 1, %s1305_s30  }
  0x18   : > { %v1138_v0 = vld [vmem:[%s1613_s1 + $0x8] sm:$0xff]  ;;  %v1137_v1 = vld [vmem:[%s1613_s1] sm:$0xff]  ;;  %s460_s18 = scalar_select %p459_p10, %s1421_s17, 1  ;;  %vm482_vm0 = vcmask 261120   ;;  %v1143_v4 = vld [vmem:[%s1593_s3 + $0x10] sm:$0xff]  ;;  %vm577_vm5 = vcmask 392192  }
  0x19   : > { %492 = vmatpush.bf16.msra.mxu0 %v1138_v0  ;;  %586 = vmatpush.bf16.msra.mxu2 %v1143_v4  ;;  %v1142_v5 = vld [vmem:[%s1593_s3 + $0x8] sm:$0xff]  ;;  %v1141_v6 = vld [vmem:[%s1593_s3] sm:$0xff]  ;;  %v1315_v26 = vmov 4   ;;  %v1316_v27 = vmov 2   ;;  %v1317_v28 = vmov 0   ;;  %v1318_v35 = vmov 5  }
  0x1a   : > { %s1059_s20 = sshll.u32 %s460_s18, 3  ;;  %v1140_v9 = vld [vmem:[%s1615_s2 + $0x8] sm:$0xff]  ;;  %v1139_v10 = vld [vmem:[%s1615_s2] sm:$0xff]  ;;  %1206 = vset.pattern.permute.xlu2 %v1315_v26  ;;  %1204 = vset.pattern.permute.xlu1 %v1316_v27  ;;  %v1319_v36 = vmov 3   ;;  %v1320_v37 = vmov 1   ;;  %v1321_v38 = vmov 7  }
  0x1b   : > { %s462_s15 = scalar_lea.vmem %s1614_s0, %s1059_s20  ;;  %541 = vmatpush.bf16.msra.mxu1 %v1140_v9  ;;  %1202 = vset.pattern.permute.xlu0 %v1317_v28  ;;  %v1212_v29 = vld [vmem:[%s1594_s4] ss:$0 sm:$0xff]  ;;  %v1322_v39 = vmov 6   ;;  %v1146_v62 = vld [vmem:[%s1597_s7 + $0x10] sm:$0xff]  ;;  %s1058_s18 = sshll.u32 %s456_s22, 3 }
  0x1c   : > { %v1459_v2 = vld [vmem:[%s462_s15] sm:$0xff]  ;;  %771 = vmatpush.bf16.msra.mxu3 %v1146_v62  ;;  %s1134_s15 = sshll.u32 %s1421_s17, 3  ;;  %s458_s28 = scalar_lea.vmem [#allocation2], %s1058_s18 }
  0x1d   : > { %493 = vmatpush.bf16.msra.mxu0 %v1137_v1  ;;  %v465_v3 = vpack.c.bf16 %v1459_v2, %v1459_v2  ;;  %587 = vmatpush.bf16.msra.mxu2 %v1142_v5  ;;  %v596_v44 = vld [vmem:[%s1595_s5] sm:$0xff]  ;;  %v1145_v1 = vld [vmem:[%s1597_s7 + $0x8] sm:$0xff]  ;;  %s990_s27 = scalar_lea.hbm %s1604_s14, %s1134_s15  ;;  %s992_s0 = sshll.u32 %s458_s28, 4  ;;  %s993_s0 = int_to_ptr.vmem [resolvable:$true] %s992_s0 }
  0x1e   : > { %v602_v46 = vperm.slane %v596_v44, 0  ;;  %v622_v47 = vperm.slane %v596_v44, 2  ;;  %v632_v51 = vperm.slane %v596_v44, 3  ;;  %v612_v52 = vperm.slane %v596_v44, 1  ;;  %v1144_v9 = vld [vmem:[%s1597_s7] sm:$0xff]  ;;  %s994_s1 = sshll.u32 %s990_s27, 4  ;;  %s995_s1 = int_to_ptr.hbm [resolvable:$true] %s994_s1 }
  0x1f   : > { %542 = vmatpush.bf16.msra.mxu1 %v1139_v10  ;;  %v642_v53 = vperm.slane %v596_v44, 4  ;;  %v652_v55 = vperm.slane %v596_v44, 5  ;;  %v672_v4 = vperm.slane %v596_v44, 7  ;;  %s980_s17 = scalar_lea.sflag [#allocation3], %s456_s22  ;;  %s1265_s2 = sshra.s32 %s995_s1, 4  ;;  %s1266_s2 = int_to_ptr.hbm [resolvable:$true] %s1265_s2 }
  0x20   : > { %1068 = vmatmul.msk.bf16.vlgmr.msra.gmra.mxu0 %vm482_vm0, %v465_v3  ;;  %772 = vmatpush.bf16.msra.mxu3 %v1145_v1  ;;  %s1267_s20 = scalar_lea.hbm %s1266_s2, 8  ;;  %s1271_s18 = scalar_lea.hbm %s1604_s14, 16 }
  0x21   : > { %588 = vmatpush.bf16.msra.mxu2 %v1141_v6  ;;  %p1268_p11 = scmp.ne.s32.totalorder %s1266_s2, %s1267_s20  ;;  %p1272_p0 = scmp.lt.s32.totalorder %s1266_s2, %s1604_s14 }
  0x22   : > { %1078 = vmatmul.msk.bf16.vlgmr.msra.gmra.mxu1 %vm482_vm0, %v465_v3  ;;  %p1273_p1 = scmp.lt.s32.totalorder %s1271_s18, %s1267_s20 }
  0x23   : > { %p1269_p12 = pnand %p1268_p11, %p1438_p5 }
  0x24   : > { %773 = vmatpush.bf16.msra.mxu3 %v1144_v9  ;;  %p1274_p2 = por %p1273_p1, %p1272_p0 }
  0x25   : > { %p1270_p13 = pneg %p1269_p12 }
  0x27   : > { %p1275_p3 = pnand %p1274_p2, %p1270_p13 }
  0x9d   : > { %v495_v7 = vpop.f32.mrf.mxu0 }
  0x9e   : > { %v1069_v8 = vmul.f32 -1.442695, %v495_v7 }
  0x9f   : > { %v1488_v40 = vpop.f32.mrf.mxu1 }
  0xa0   : > { %1217 = vpow2.f32 %v1069_v8  ;;  %v1092_v54 = vmul.f32 -1.442695, %v1488_v40  ;;  %v662_v8 = vperm.slane %v596_v44, 6 }
  0xa5   : > { %v497_v11 = vpop.f32.mrf.mxu0 }
  0xa6   : > { %v1218_v12 = vpop.eup %1217 }
  0xa7   : > { %v502_v13 = vadd.f32 1.0, %v1218_v12  ;;  %v546_v41 = vpop.f32.mrf.mxu1 }
  0xa9   : > { %1219 = vrcp.f32 %v502_v13  ;;  %v514_v17 = vand.u32 2147483648, %v502_v13  ;;  %v512_v19 = vand.u32 2147483647, %v502_v13  ;;  %vm508_vm2 = vweird.f32 %v502_v13 }
  0xaa   : > { %1221 = vpow2.f32 %v1092_v54 }
  0xab   : > { %v515_v21 = vor.u32 1.1754944e-38, %v514_v17  ;;  %vm513_vm4 = vcmp.eq.f32.partialorder %v512_v19, 8.507059e+37 }
  0xaf   : > { %v1220_v14 = vpop.eup %1219 }
  0xb0   : > { %v504_v15 = vmul.f32 %v1220_v14, %v502_v13  ;;  %vm509_vm1 = vweird.f32 %v1220_v14  ;;  %v1222_v10 = vpop.eup %1221 }
  0xb1   : > { %vm510_vm3 = vmor %vm508_vm2, %vm509_vm1  ;;  %v720_v17 = vadd.f32 1.0, %v1222_v10 }
  0xb2   : > { %v505_v16 = vsub.f32 1.0, %v504_v15 }
  0xb3   : > { %vm726_vm7 = vweird.f32 %v720_v17 }
  0xb4   : > { %v506_v18 = vmul.f32 %v1220_v14, %v505_v16 }
  0xb6   : > { %v507_v20 = vadd.f32 %v1220_v14, %v506_v18 }
  0xb8   : > { %v511_v22 = vsel %vm510_vm3, %v1220_v14, %v507_v20 }
  0xb9   : > { %v516_v23 = vsel %vm513_vm4, %v515_v21, %v511_v22 }
  0xba   : > { %v1480_v24 = vmul.f32 %v516_v23, %v495_v7 }
  0xbc   : > { %v548_v25 = vpack.c.bf16 %v1480_v24, %v1480_v24 }
  0xbe   : > { %1091 = vmatmul.msk.bf16.vlgmr.msra.gmra.mxu2 %vm577_vm5, %v548_v25 }
 0x141   : > { %v590_v30 = vpop.f32.mrf.mxu2 }
 0x142   : > { %v591_v31 = vadd.f32 %v1212_v29, %v590_v30 }
 0x144   : > { %v594_v32 = vmax.f32 %v591_v31, 0.001 }
 0x146   : > { %v595_v33 = vmin.f32 %v594_v32, 0.1 }
 0x148   : > { %639 = vperm.xlu2 %1206, %v595_v33   ;;  %619 = vperm.xlu1 %1204, %v595_v33  }
 0x149   : > { %599 = vperm.xlu0 %1202, %v595_v33   ;;  %v592_v34 = vpop.f32.mrf.mxu2 }
 0x14a   : > { %v679_v34 = vlaneseq }
 0x150   : > { %1207 = vset.pattern.permute.xlu2 %v1318_v35  ;;  %1205 = vset.pattern.permute.xlu1 %v1319_v36 }
 0x151   : > { %1203 = vset.pattern.permute.xlu0 %v1320_v37  ;;  %649 = vperm.xlu2 %1207, %v595_v33  }
 0x152   : > { %629 = vperm.xlu1 %1205, %v595_v33   ;;  %609 = vperm.xlu0 %1203, %v595_v33  }
 0x159   : > { %1209 = vset.pattern.permute.xlu2 %v1321_v38 }
 0x15a   : > { %1208 = vset.pattern.permute.xlu1 %v1322_v39  ;;  %669 = vperm.xlu2 %1209, %v595_v33  }
 0x15b   : > { %659 = vperm.xlu1 %1208, %v595_v33   ;;  %1210 = vset.pattern.permute.xlu0 %v1321_v38 }
 0x1a2   : > { %v1490_v42 = vpop.permute.xlu2 %639 }
 0x1a3   : > { %v643_v63 = vmul.f32 %v642_v53, %v1490_v42 }
 0x1a5   : > { %v644_v7 = vmul.f32 1.442695, %v643_v63 }
 0x1ab   : > { %v1495_v48 = vpop.permute.xlu2 %649 }
 0x1ac   : > { %v653_v3 = vmul.f32 %v652_v55, %v1495_v48 }
 0x1ae   : > { %v654_v11 = vmul.f32 1.442695, %v653_v3 }
 0x1b4   : > { %v670_v6 = vpop.permute.xlu2 %669 }
 0x1b5   : > { %v673_v12 = vmul.f32 %v672_v4, %v670_v6 }
 0x1b7   : > { %v674_v19 = vmul.f32 1.442695, %v673_v12 }
 0x1ba   : > { %v620_v43 = vpop.permute.xlu1 %619 }
 0x1bb   : > { %v600_v45 = vpop.permute.xlu0 %599  ;;  %v623_v50 = vmul.f32 %v622_v47, %v620_v43 }
 0x1bc   : > { %v603_v49 = vmul.f32 %v602_v46, %v600_v45 }
 0x1bd   : > { %v624_v59 = vmul.f32 1.442695, %v623_v50 }
 0x1be   : > { %v604_v56 = vmul.f32 1.442695, %v603_v49 }
 0x1c0   : > { %1223 = vpow2.f32 %v604_v56  ;;  %v730_v56 = vand.u32 2147483647, %v720_v17 }
 0x1c1   : > { %1225 = vpow2.f32 %v624_v59 }
 0x1c2   : > { %vm731_vm11 = vcmp.eq.f32.partialorder %v730_v56, 8.507059e+37 }
 0x1c4   : > { %v630_v57 = vpop.permute.xlu1 %629  ;;  %v610_v58 = vpop.permute.xlu0 %609 }
 0x1c5   : > { %v633_v60 = vmul.f32 %v632_v51, %v630_v57  ;;  %v613_v61 = vmul.f32 %v612_v52, %v610_v58 }
 0x1c6   : > { %v1224_v14 = vpop.eup %1223 }
 0x1c7   : > { %v614_v0 = vmul.f32 1.442695, %v613_v61  ;;  %v634_v5 = vmul.f32 1.442695, %v633_v60  ;;  %v1226_v16 = vpop.eup %1225  ;;  %v606_v21 = vmul.f32 %v1224_v14, %v600_v45  ;;  %v1211_v60 = vld [vmem:[%s1596_s6] ss:$0 sm:$0xff] }
 0x1c8   : > { %v626_v25 = vmul.f32 %v1226_v16, %v620_v43  ;;  %v680_v43 = vshrl.u32 %v679_v34, 7  ;;  %v715_v3 = vmul.f32 %v1211_v60, %v1480_v24 }
 0x1c9   : > { %1227 = vpow2.f32 %v614_v0 }
 0x1ca   : > { %1229 = vpow2.f32 %v634_v5  ;;  %v685_v50 = vand.u32 7, %v680_v43 }
 0x1cb   : > { %1231 = vpow2.f32 %v644_v7 }
 0x1cc   : > { %1233 = vpow2.f32 %v654_v11  ;;  %vm694_vm6 = vcmp.ge.s32.totalorder %v685_v50, 1  ;;  %vm700_vm10 = vcmp.ge.s32.totalorder %v685_v50, 2  ;;  %vm706_vm12 = vcmp.ge.s32.totalorder %v685_v50, 4  ;;  %v1213_v50 = vld [vmem:[%s1598_s8] ss:$0 sm:$0xff] }
 0x1cd   : > { %v660_v13 = vpop.permute.xlu1 %659 }
 0x1ce   : > { %v663_v15 = vmul.f32 %v662_v8, %v660_v13 }
 0x1cf   : > { %v1228_v18 = vpop.eup %1227 }
 0x1d0   : > { %v664_v20 = vmul.f32 1.442695, %v663_v15  ;;  %v616_v22 = vmul.f32 %v1228_v18, %v610_v58  ;;  %v1230_v23 = vpop.eup %1229 }
 0x1d1   : > { %v1232_v27 = vpop.eup %1231  ;;  %v636_v28 = vmul.f32 %v1230_v23, %v630_v57  ;;  %v1147_v23 = vld [vmem:[%s1600_s10] sm:$0xff] }
 0x1d2   : > { %1235 = vpow2.f32 %v664_v20  ;;  %v617_v26 = vadd.f32 %v616_v22, %v606_v21  ;;  %v1234_v30 = vpop.eup %1233  ;;  %v646_v31 = vmul.f32 %v1232_v27, %v1490_v42  ;;  %v1148_v22 = vld [vmem:[%s1600_s10 + $0x8] sm:$0xff] }
 0x1d3   : > { %1237 = vrcp.f32 %v720_v17  ;;  %v656_v36 = vmul.f32 %v1234_v30, %v1495_v48  ;;  %v732_v48 = vand.u32 2147483648, %v720_v17  ;;  %865 = vmatpush.bf16.msrb.mxu0 %v1148_v22 }
 0x1d4   : > { %1239 = vpow2.f32 %v674_v19  ;;  %v627_v29 = vadd.f32 %v626_v25, %v617_v26 }
 0x1d5   : > { %v733_v59 = vor.u32 1.1754944e-38, %v732_v48 }
 0x1d6   : > { %v637_v32 = vadd.f32 %v636_v28, %v627_v29 }
 0x1d7   : > { %866 = vmatpush.bf16.msrb.mxu0 %v1147_v23 }
 0x1d8   : > { %v1236_v33 = vpop.eup %1235  ;;  %v647_v37 = vadd.f32 %v646_v31, %v637_v32 }
 0x1d9   : > { %v1238_v35 = vpop.eup %1237  ;;  %v666_v38 = vmul.f32 %v1236_v33, %v660_v13  ;;  %v1323_v13 = vmov 32.0  }
 0x1da   : > { %v1240_v39 = vpop.eup %1239  ;;  %v657_v41 = vadd.f32 %v656_v36, %v647_v37  ;;  %v722_v44 = vmul.f32 %v1238_v35, %v720_v17  ;;  %vm727_vm8 = vweird.f32 %v1238_v35  ;;  %1241 = vrcp.f32 %v1323_v13 }
 0x1db   : > { %v676_v45 = vmul.f32 %v1240_v39, %v670_v6  ;;  %vm728_vm9 = vmor %vm726_vm7, %vm727_vm8 }
 0x1dc   : > { %v667_v46 = vadd.f32 %v666_v38, %v657_v41  ;;  %v723_v49 = vsub.f32 1.0, %v722_v44 }
 0x1de   : > { %v677_v47 = vadd.f32 %v676_v45, %v667_v46  ;;  %v724_v52 = vmul.f32 %v1238_v35, %v723_v49 }
 0x1e0   : > { %v678_v51 = vmul.f32 %v677_v47, %v1480_v24  ;;  %v725_v55 = vadd.f32 %v1238_v35, %v724_v52  ;;  %v1242_v24 = vpop.eup %1241  ;;  %v1214_v52 = vld [vmem:[%s1599_s9] ss:$0 sm:$0xff] }
 0x1e1   : > { %v784_v14 = vmul.f32 32.0, %v1242_v24  ;;  %vm788_vm13 = vweird.f32 %v1242_v24 }
 0x1e2   : > { %v693_v42 = vrot.slane %v678_v51, 7  ;;  %v729_v61 = vsel %vm728_vm9, %v1238_v35, %v725_v55  ;;  %v1324_v55 = vmov 1.4142135  }
 0x1e3   : > { %v734_v0 = vsel %vm731_vm11, %v733_v59, %v729_v61  ;;  %v785_v15 = vsub.f32 1.0, %v784_v14  ;;  %v1215_v61 = vld [vmem:[%s1601_s11] ss:$0 sm:$0xff] }
 0x1e4   : > { %v695_v53 = vadd.f32 %v693_v42, %v678_v51  ;;  %v736_v5 = vmul.f32 %v734_v0, %v1488_v40 }
 0x1e5   : > { %v786_v40 = vmul.f32 %v1242_v24, %v785_v15 }
 0x1e6   : > { %v698_v54 = vsel %vm694_vm6, %v695_v53, %v678_v51 }
 0x1e7   : > { %v699_v57 = vrot.slane %v698_v54, 6  ;;  %v787_v16 = vadd.f32 %v1242_v24, %v786_v40  ;;  %v1150_v40 = vld [vmem:[%s1602_s12 + $0x8] sm:$0xff] }
 0x1e9   : > { %v701_v58 = vadd.f32 %v699_v57, %v698_v54  ;;  %v789_v17 = vsel %vm788_vm13, %v1242_v24, %v787_v16 }
 0x1eb   : > { %v704_v62 = vsel %vm700_vm10, %v701_v58, %v698_v54  ;;  %vm960_vm10 = vcmask 523264  }
 0x1ec   : > { %v705_v63 = vrot.slane %v704_v62, 4 }
 0x1ee   : > { %v707_v1 = vadd.f32 %v705_v63, %v704_v62 }
 0x1f0   : > { %v710_v4 = vsel %vm706_vm12, %v707_v1, %v704_v62 }
 0x1f1   : > { %v716_v6 = vadd.f32 %v715_v3, %v710_v4 }
 0x1f3   : > { %v737_v7 = vmul.f32 %v736_v5, %v716_v6  ;;  %v1152_v6 = vld [vmem:[%s1602_s12 + $0x18] sm:$0xff] }
 0x1f4   : > { %968 = vmatpush.bf16.msrb.mxu1 %v1152_v6 }
 0x1f5   : > { %v738_v8 = vpack.c.bf16 %v737_v7, %v737_v7 }
 0x1f7   : > { %1105 = vmatmul.msk.bf16.vlgmr.msra.gmra.mxu3 %vm577_vm5, %v738_v8 }
 0x27a   : > { %v775_v9 = vpop.f32.mrf.mxu3 }
 0x27b   : > { %v1519_v10 = vadd.f32 %v775_v9, %v1459_v2 }
 0x27d   : > { %v780_v11 = vsel %vm482_vm0, %v1519_v10, 0.0 }
 0x27e   : > { %781 = vadd.xlane.f32.xlu0 %v780_v11 }
 0x282   : > { %v777_v12 = vpop.f32.mrf.mxu3 }
 0x283   : > { %v1151_v12 = vld [vmem:[%s1602_s12 + $0x10] sm:$0xff] }
 0x284   : > { %969 = vmatpush.bf16.msrb.mxu1 %v1151_v12 }
 0x288   : > { %970 = vmatpush.bf16.msrb.mxu1 %v1150_v40 }
 0x2f1   : > { %v782_v18 = vpop.xlane.xlu0 %781 }
 0x2f2   : > { %v790_v19 = vmul.f32 %v789_v17, %v782_v18 }
 0x2f4   : > { %v791_v20 = vsub.f32 %v1519_v10, %v790_v19  ;;  %v1149_v19 = vld [vmem:[%s1602_s12] sm:$0xff] }
 0x2f5   : > { %971 = vmatpush.bf16.msrb.mxu1 %v1149_v19 }
 0x2f6   : > { %v792_v2 = vmul.f32 %v791_v20, %v791_v20 }
 0x2f8   : > { %v793_v21 = vsel %vm482_vm0, %v792_v2, 0.0 }
 0x2f9   : > { %794 = vadd.xlane.f32.xlu1 %v793_v21 }
 0x36c   : > { %v795_v25 = vpop.xlane.xlu1 %794 }
 0x36d   : > { %v796_v26 = vmul.f32 %v795_v25, %v789_v17 }
 0x36f   : > { %v797_v27 = vadd.f32 1e-05, %v796_v26 }
 0x371   : > { %1243 = vrsqrt.f32 %v797_v27  ;;  %vm805_vm14 = vcmp.eq.f32.partialorder %v797_v27, inf  ;;  %v808_v35 = vand.u32 2147483648, %v797_v27  ;;  %vm807_vm15 = vcmp.eq.f32.partialorder %v797_v27, 0.0 }
 0x377   : > { %v1244_v28 = vpop.eup %1243 }
 0x378   : > { %v799_v29 = vmul.f32 %v1244_v28, %v797_v27 }
 0x37a   : > { %v800_v30 = vmul.f32 %v1244_v28, %v799_v29 }
 0x37c   : > { %v801_v31 = vmul.f32 0.5, %v800_v30 }
 0x37e   : > { %v802_v32 = vsub.f32 1.5, %v801_v31 }
 0x380   : > { %v803_v33 = vmul.f32 %v1244_v28, %v802_v32 }
 0x382   : > { %v804_v34 = vmul.f32 %v803_v33, %v797_v27 }
 0x384   : > { %v806_v36 = vsel %vm805_vm14, %v797_v27, %v804_v34 }
 0x385   : > { %v809_v37 = vsel %vm807_vm15, %v808_v35, %v806_v36 }
 0x386   : > { %1245 = vrcp.f32 %v809_v37  ;;  %v821_v44 = vand.u32 2147483648, %v809_v37  ;;  %v819_v45 = vand.u32 2147483647, %v809_v37  ;;  %vm815_vm2 = vweird.f32 %v809_v37 }
 0x387   : > { %1247 = vrcp.f32 %v1324_v55 }
 0x388   : > { %v822_v47 = vor.u32 1.1754944e-38, %v821_v44  ;;  %vm820_vm4 = vcmp.eq.f32.partialorder %v819_v45, 8.507059e+37 }
 0x38c   : > { %v1246_v38 = vpop.eup %1245 }
 0x38d   : > { %v811_v39 = vmul.f32 %v1246_v38, %v809_v37  ;;  %vm816_vm1 = vweird.f32 %v1246_v38  ;;  %v1248_v56 = vpop.eup %1247 }
 0x38e   : > { %vm817_vm3 = vmor %vm815_vm2, %vm816_vm1  ;;  %v874_v57 = vmul.f32 1.4142135, %v1248_v56  ;;  %vm878_vm5 = vweird.f32 %v1248_v56 }
 0x38f   : > { %v812_v41 = vsub.f32 1.0, %v811_v39 }
 0x390   : > { %v875_v58 = vsub.f32 1.0, %v874_v57 }
 0x391   : > { %v813_v43 = vmul.f32 %v1246_v38, %v812_v41 }
 0x392   : > { %v876_v59 = vmul.f32 %v1248_v56, %v875_v58 }
 0x393   : > { %v814_v46 = vadd.f32 %v1246_v38, %v813_v43 }
 0x394   : > { %v877_v60 = vadd.f32 %v1248_v56, %v876_v59 }
 0x395   : > { %v818_v49 = vsel %vm817_vm3, %v1246_v38, %v814_v46 }
 0x396   : > { %v823_v51 = vsel %vm820_vm4, %v822_v47, %v818_v49  ;;  %v879_v63 = vsel %vm878_vm5, %v1248_v56, %v877_v60  ;;  %v1216_v49 = vld [vmem:[%s1603_s13] ss:$0 sm:$0xff] }
 0x397   : > { %v824_v42 = vmul.f32 %v823_v51, %v791_v20 }
 0x399   : > { %v829_v53 = vmul.f32 %v1213_v50, %v824_v42 }
 0x39b   : > { %v834_v48 = vadd.f32 %v1214_v52, %v829_v53 }
 0x39d   : > { %v835_v54 = vpack.c.bf16 %v834_v48, %v834_v48 }
 0x39f   : > { %1114 = vmatmul.msk.bf16.vlgmr.msrb.gmra.mxu0 %vm482_vm0, %v835_v54 }
 0x41c   : > { %v868_v62 = vpop.f32.mrf.mxu0 }
 0x41d   : > { %v869_v0 = vadd.f32 %v1215_v61, %v868_v62 }
 0x41f   : > { %v880_v1 = vmul.f32 %v879_v63, %v869_v0  ;;  %v872_v43 = vmul.f32 0.5, %v869_v0 }
 0x421   : > { %v881_v3 = vmul.f32 %v880_v1, %v880_v1 }
 0x423   : > { %v882_v4 = vmin.f32 %v881_v3, 16.0 }
 0x424   : > { %v870_v5 = vpop.f32.mrf.mxu0 }
 0x425   : > { %v883_v7 = vmul.f32 2.1237322e-06, %v882_v4  ;;  %v894_v8 = vmul.f32 3.8918573e-05, %v882_v4 }
 0x427   : > { %v884_v9 = vadd.f32 0.00028619796, %v883_v7  ;;  %v895_v11 = vadd.f32 0.001143296, %v894_v8 }
 0x429   : > { %v885_v13 = vmul.f32 %v884_v9, %v882_v4  ;;  %v896_v24 = vmul.f32 %v895_v11, %v882_v4 }
 0x42b   : > { %v897_v14 = vadd.f32 0.014752088, %v896_v24  ;;  %v886_v15 = vadd.f32 0.0036580483, %v885_v13 }
 0x42d   : > { %v898_v16 = vmul.f32 %v897_v14, %v882_v4  ;;  %v887_v18 = vmul.f32 %v886_v15, %v882_v4 }
 0x42f   : > { %v899_v17 = vadd.f32 0.112945676, %v898_v16  ;;  %v888_v21 = vadd.f32 0.05243302, %v887_v18 }
 0x431   : > { %v900_v20 = vmul.f32 %v899_v17, %v882_v4  ;;  %v889_v25 = vmul.f32 %v888_v21, %v882_v4 }
 0x433   : > { %v901_v2 = vadd.f32 0.4994258, %v900_v20  ;;  %v890_v26 = vadd.f32 0.18741608, %v889_v25 }
 0x435   : > { %v902_v22 = vmul.f32 %v901_v2, %v882_v4  ;;  %v891_v28 = vmul.f32 %v890_v26, %v882_v4 }
 0x437   : > { %v903_v23 = vadd.f32 1.0, %v902_v22  ;;  %v892_v32 = vadd.f32 1.1283791, %v891_v28 }
 0x439   : > { %1249 = vrcp.f32 %v903_v23  ;;  %v915_v31 = vand.u32 2147483648, %v903_v23  ;;  %v913_v34 = vand.u32 2147483647, %v903_v23  ;;  %vm909_vm7 = vweird.f32 %v903_v23 }
 0x43a   : > { %v893_v37 = vmul.f32 %v892_v32, %v880_v1 }
 0x43b   : > { %v916_v36 = vor.u32 1.1754944e-38, %v915_v31  ;;  %vm914_vm9 = vcmp.eq.f32.partialorder %v913_v34, 8.507059e+37 }
 0x43f   : > { %v1250_v27 = vpop.eup %1249 }
 0x440   : > { %v905_v29 = vmul.f32 %v1250_v27, %v903_v23  ;;  %vm910_vm6 = vweird.f32 %v1250_v27 }
 0x441   : > { %vm911_vm8 = vmor %vm909_vm7, %vm910_vm6 }
 0x442   : > { %v906_v30 = vsub.f32 1.0, %v905_v29 }
 0x444   : > { %v907_v33 = vmul.f32 %v1250_v27, %v906_v30 }
 0x446   : > { %v908_v35 = vadd.f32 %v1250_v27, %v907_v33 }
 0x448   : > { %v912_v38 = vsel %vm911_vm8, %v1250_v27, %v908_v35 }
 0x449   : > { %v917_v39 = vsel %vm914_vm9, %v916_v36, %v912_v38 }
 0x44a   : > { %v918_v41 = vmul.f32 %v917_v39, %v893_v37 }
 0x44c   : > { %v1115_v44 = vclamps-f32 %v918_v41, 1.0 }
 0x44e   : > { %v921_v45 = vadd.f32 1.0, %v1115_v44 }
 0x450   : > { %v922_v46 = vmul.f32 %v921_v45, %v872_v43 }
 0x452   : > { %v923_v47 = vpack.c.bf16 %v922_v46, %v922_v46 }
 0x454   : > { %1132 = vmatmul.msk.bf16.vlgmr.msrb.gmra.mxu1 %vm960_vm10, %v923_v47 }
 0x4d1   : > { %v973_v50 = vpop.f32.mrf.mxu1 }
 0x4d2   : > { %v974_v51 = vadd.f32 %v1216_v49, %v973_v50 }
 0x4d4   : > { %v977_v42 = vadd.f32 %v974_v51, %v1519_v10 }
 0x4d6   : > { %978 = vst.msk [vmem:[%s458_s28] sm:$0xff] %vm482_vm0, %v977_v42 }
 0x4d7   : > { %1278 = shalt.err (!%p1275_p3)
}
 0x4d8   : > { %1153 = dma.vmem_to_hbm [thread:$0]  (%p1438_p5), %s993_s0, 128, %s995_s1, %s980_s17  }
 0x4d9   : > { %v975_v10 = vpop.f32.mrf.mxu1 }
 0x4da PF: > { %p1159_p4 = scmp.ge.s32.totalorder %s1313_s16, 2  ;;  %s1006_s22 = sand.u32 1, %s1301_s29  }
 0x4db   : > { %s1007_s27 = scalar_lea.sflag [#allocation3], %s1006_s22 }
 0x4dc   : > { %p1156_p7 = pnand %p1159_p4, %p1442_p6 }
 0x4de   : > { %p1157_p8 = pneg %p1156_p7 }
 0x4e0   : > { %1296 = dma.done.wait (%p1157_p8), %s1007_s27, 128  }
 0x4e1   : > { %1298 = vsyncadd (%p1157_p8), %s1007_s27, 4294967168  ;;  %s1616_s2 = sld [smem:[#allocation5_spill]]  ;;  %p24_p9 = scmp.ge.s32.totalorder %s1425_s19, 4  }
 0x4e2   : > { %s1617_s15 = sld [smem:[#allocation6_spill]]  ;;  %s1618_s29 = smov %s1305_s30 }
 0x4e3   : > { %s1620_s16 = smov %s1425_s19  ;;  %26 = sbr.rel (!%p24_p9) target bundleno = 7 (0x7), region = 111 }
 0x4e7   : > { %s1619_s30 = smov %s1616_s2 }
 0x4e8   :  { %1013 = vsyncpa [#allocation3], 1 }
 0x4e9   :  { %1015 = vsyncpa [#allocation3 + $0x1], 1 }

// kernel: tpu_custom_call.1
= control target key start
LH: loop header
LB: loop body
LE: loop exit
PB: predicated region body
PF: predicated region fallthrough
CT: control target
= control target key end

     0   :  { %s1590_s0 = inlined_call_operand.vmem [shape: f32[16,32], index: 0, kind: input, shape index: {}]   ;;  %s1591_s1 = inlined_call_operand.vmem [shape: bf16[32,48], index: 1, kind: input, shape index: {}]   ;;  %s1592_s2 = inlined_call_operand.vmem [shape: bf16[32,48], index: 2, kind: input, shape index: {}]   ;;  %s1593_s3 = inlined_call_operand.vmem [shape: bf16[48,8], index: 3, kind: input, shape index: {}]   ;;  %s1594_s4 = inlined_call_operand.vmem [shape: f32[1,8], index: 4, kind: input, shape index: {}]   ;;  %s1595_s5 = inlined_call_operand.vmem [shape: f32[8,48], index: 5, kind: input, shape index: {}]   ;;  %s1596_s6 = inlined_call_operand.vmem [shape: f32[1,48], index: 6, kind: input, shape index: {}]   ;;  %s1597_s7 = inlined_call_operand.vmem [shape: bf16[48,32], index: 7, kind: input, shape index: {}]   ;;  %s1598_s8 = inlined_call_operand.vmem [shape: f32[1,32], index: 8, kind: input, shape index: {}]   ;;  %s1599_s9 = inlined_call_operand.vmem [shape: f32[1,32], index: 9, kind: input, shape index: {}]   ;;  %s1600_s10 = inlined_call_operand.vmem [shape: bf16[32,64], index: 10, kind: input, shape index: {}]   ;;  %s1601_s11 = inlined_call_operand.vmem [shape: f32[1,64], index: 11, kind: input, shape index: {}]   ;;  %s1602_s12 = inlined_call_operand.vmem [shape: bf16[64,32], index: 12, kind: input, shape index: {}]   ;;  %s1603_s13 = inlined_call_operand.vmem [shape: f32[1,32], index: 13, kind: input, shape index: {}]   ;;  %s1604_s14 = inlined_call_operand.hbm [shape: f32[16,32], index: 14, kind: output, shape index: {}]  }
   0x1   :  { %1606 = sst [smem:[#allocation7_spill]] %s1590_s0 }
   0x2   :  { %1607 = sst [smem:[#allocation8_spill]] %s1591_s1 }
   0x3   :  { %1608 = sst [smem:[#allocation9_spill]] %s1592_s2 }
   0x4   :  { %19 = vsyncpa [#allocation3], 0 }
   0x5   :  { %21 = vsyncpa [#allocation3 + $0x1], 0  ;;  %s1400_s29 = smov 0   ;;  %s1402_s30 = smov 0  }
   0x6   :  { %s1404_s15 = smov 0   ;;  %s1406_s16 = smov 0  }
   0x7 LB: > { %1609 = sst [smem:[#allocation5_spill]] %s1309_s15  ;;  %s1421_s17 = sadd.s32 4294967295, %s1313_s16   ;;  %s1313_s16 = sphi %s1406_s16, %s1620_s16   ;;  %s1309_s15 = sphi %s1404_s15, %s1617_s15   ;;  %s1305_s30 = sphi %s1402_s30, %s1619_s30   ;;  %s1301_s29 = sphi %s1400_s29, %s1618_s29  }
   0x8   : > { %s1054_s18 = sadd.s32 4294967294, %s1313_s16   ;;  %s1425_s19 = sadd.s32 1, %s1313_s16  }
   0x9   : > { %s333_s20 = sadd.s32 1, %s1309_s15  ;;  %s330_s21 = ssub.s32 %s1313_s16, %s1425_s19 }
   0xa   : > { %p343_p0 = scmp.ne.s32.totalorder %s1309_s15, %s1305_s30  ;;  %p331_p1 = scmp.eq.s32.totalorder %s330_s21, 0 }
   0xb   : > { %p344_p2 = scmp.eq.s32.totalorder %s1421_s17, 1  ;;  %p349_p3 = scmp.ne.s32.totalorder %s1305_s30, %s1301_s29 }
   0xc   : > { %p350_p4 = scmp.eq.s32.totalorder %s1054_s18, 1  ;;  %p1057_p7 = scmp.ge.s32.totalorder %s1313_s16, 1 }
   0xd   : > { %s1436_s22 = scalar_select %p331_p1, %s1309_s15, %s333_s20  }
   0xe   : > { %p1438_p5 = por %p344_p2, %p343_p0  ;;  %p1442_p6 = por %p350_p4, %p349_p3 }
   0xf   : > { %1610 = sst [smem:[#allocation6_spill]] %s1436_s22  ;;  %p414_p8 = scmp.lt.s32.totalorder %s1313_s16, 3 }
  0x11   : > { %p415_p9 = pnand %p1057_p7, %p414_p8 }
  0x12   : > { %s1613_s1 = sld [smem:[#allocation8_spill]] (!%p415_p9)  ;;  %p459_p10 = scmp.lt.s32.totalorder (!%p415_p9), %s1421_s17, 1 }
  0x13   : > { %418 = sbr.rel (%p415_p9) target bundleno = 1242 (0x4da), region = 76  ;;  %s1614_s0 = sld [smem:[#allocation7_spill]] (!%p415_p9) }
  0x14   : > { %s1615_s2 = sld [smem:[#allocation9_spill]] (!%p415_p9)  ;;  %s456_s22 = sand.u32 (!%p415_p9), 1, %s1305_s30  }
  0x18   : > { %v1138_v0 = vld [vmem:[%s1613_s1 + $0x8] sm:$0xff]  ;;  %v1137_v1 = vld [vmem:[%s1613_s1] sm:$0xff]  ;;  %s460_s18 = scalar_select %p459_p10, %s1421_s17, 1  ;;  %vm482_vm0 = vcmask 261120   ;;  %v1143_v4 = vld [vmem:[%s1593_s3 + $0x10] sm:$0xff]  ;;  %vm577_vm5 = vcmask 392192  }
  0x19   : > { %492 = vmatpush.bf16.msra.mxu0 %v1138_v0  ;;  %586 = vmatpush.bf16.msra.mxu2 %v1143_v4  ;;  %v1142_v5 = vld [vmem:[%s1593_s3 + $0x8] sm:$0xff]  ;;  %v1141_v6 = vld [vmem:[%s1593_s3] sm:$0xff]  ;;  %v1315_v26 = vmov 4   ;;  %v1316_v27 = vmov 2   ;;  %v1317_v28 = vmov 0   ;;  %v1318_v35 = vmov 5  }
  0x1a   : > { %s1059_s20 = sshll.u32 %s460_s18, 3  ;;  %v1140_v9 = vld [vmem:[%s1615_s2 + $0x8] sm:$0xff]  ;;  %v1139_v10 = vld [vmem:[%s1615_s2] sm:$0xff]  ;;  %1206 = vset.pattern.permute.xlu2 %v1315_v26  ;;  %1204 = vset.pattern.permute.xlu1 %v1316_v27  ;;  %v1319_v36 = vmov 3   ;;  %v1320_v37 = vmov 1   ;;  %v1321_v38 = vmov 7  }
  0x1b   : > { %s462_s15 = scalar_lea.vmem %s1614_s0, %s1059_s20  ;;  %541 = vmatpush.bf16.msra.mxu1 %v1140_v9  ;;  %1202 = vset.pattern.permute.xlu0 %v1317_v28  ;;  %v1212_v29 = vld [vmem:[%s1594_s4] ss:$0 sm:$0xff]  ;;  %v1322_v39 = vmov 6   ;;  %v1146_v62 = vld [vmem:[%s1597_s7 + $0x10] sm:$0xff]  ;;  %s1058_s18 = sshll.u32 %s456_s22, 3 }
  0x1c   : > { %v1459_v2 = vld [vmem:[%s462_s15] sm:$0xff]  ;;  %771 = vmatpush.bf16.msra.mxu3 %v1146_v62  ;;  %s1134_s15 = sshll.u32 %s1421_s17, 3  ;;  %s458_s28 = scalar_lea.vmem [#allocation2], %s1058_s18 }
  0x1d   : > { %493 = vmatpush.bf16.msra.mxu0 %v1137_v1  ;;  %v465_v3 = vpack.c.bf16 %v1459_v2, %v1459_v2  ;;  %587 = vmatpush.bf16.msra.mxu2 %v1142_v5  ;;  %v596_v44 = vld [vmem:[%s1595_s5] sm:$0xff]  ;;  %v1145_v1 = vld [vmem:[%s1597_s7 + $0x8] sm:$0xff]  ;;  %s990_s27 = scalar_lea.hbm %s1604_s14, %s1134_s15  ;;  %s992_s0 = sshll.u32 %s458_s28, 4  ;;  %s993_s0 = int_to_ptr.vmem [resolvable:$true] %s992_s0 }
  0x1e   : > { %v602_v46 = vperm.slane %v596_v44, 0  ;;  %v622_v47 = vperm.slane %v596_v44, 2  ;;  %v632_v51 = vperm.slane %v596_v44, 3  ;;  %v612_v52 = vperm.slane %v596_v44, 1  ;;  %v1144_v9 = vld [vmem:[%s1597_s7] sm:$0xff]  ;;  %s994_s1 = sshll.u32 %s990_s27, 4  ;;  %s995_s1 = int_to_ptr.hbm [resolvable:$true] %s994_s1 }
  0x1f   : > { %542 = vmatpush.bf16.msra.mxu1 %v1139_v10  ;;  %v642_v53 = vperm.slane %v596_v44, 4  ;;  %v652_v55 = vperm.slane %v596_v44, 5  ;;  %v672_v4 = vperm.slane %v596_v44, 7  ;;  %s980_s17 = scalar_lea.sflag [#allocation3], %s456_s22  ;;  %s1265_s2 = sshra.s32 %s995_s1, 4  ;;  %s1266_s2 = int_to_ptr.hbm [resolvable:$true] %s1265_s2 }
  0x20   : > { %1068 = vmatmul.msk.bf16.vlgmr.msra.gmra.mxu0 %vm482_vm0, %v465_v3  ;;  %772 = vmatpush.bf16.msra.mxu3 %v1145_v1  ;;  %s1267_s20 = scalar_lea.hbm %s1266_s2, 8  ;;  %s1271_s18 = scalar_lea.hbm %s1604_s14, 16 }
  0x21   : > { %588 = vmatpush.bf16.msra.mxu2 %v1141_v6  ;;  %p1268_p11 = scmp.ne.s32.totalorder %s1266_s2, %s1267_s20  ;;  %p1272_p0 = scmp.lt.s32.totalorder %s1266_s2, %s1604_s14 }
  0x22   : > { %1078 = vmatmul.msk.bf16.vlgmr.msra.gmra.mxu1 %vm482_vm0, %v465_v3  ;;  %p1273_p1 = scmp.lt.s32.totalorder %s1271_s18, %s1267_s20 }
  0x23   : > { %p1269_p12 = pnand %p1268_p11, %p1438_p5 }
  0x24   : > { %773 = vmatpush.bf16.msra.mxu3 %v1144_v9  ;;  %p1274_p2 = por %p1273_p1, %p1272_p0 }
  0x25   : > { %p1270_p13 = pneg %p1269_p12 }
  0x27   : > { %p1275_p3 = pnand %p1274_p2, %p1270_p13 }
  0x9d   : > { %v495_v7 = vpop.f32.mrf.mxu0 }
  0x9e   : > { %v1069_v8 = vmul.f32 -1.442695, %v495_v7 }
  0x9f   : > { %v1488_v40 = vpop.f32.mrf.mxu1 }
  0xa0   : > { %1217 = vpow2.f32 %v1069_v8  ;;  %v1092_v54 = vmul.f32 -1.442695, %v1488_v40  ;;  %v662_v8 = vperm.slane %v596_v44, 6 }
  0xa5   : > { %v497_v11 = vpop.f32.mrf.mxu0 }
  0xa6   : > { %v1218_v12 = vpop.eup %1217 }
  0xa7   : > { %v502_v13 = vadd.f32 1.0, %v1218_v12  ;;  %v546_v41 = vpop.f32.mrf.mxu1 }
  0xa9   : > { %1219 = vrcp.f32 %v502_v13  ;;  %v514_v17 = vand.u32 2147483648, %v502_v13  ;;  %v512_v19 = vand.u32 2147483647, %v502_v13  ;;  %vm508_vm2 = vweird.f32 %v502_v13 }
  0xaa   : > { %1221 = vpow2.f32 %v1092_v54 }
  0xab   : > { %v515_v21 = vor.u32 1.1754944e-38, %v514_v17  ;;  %vm513_vm4 = vcmp.eq.f32.partialorder %v512_v19, 8.507059e+37 }
  0xaf   : > { %v1220_v14 = vpop.eup %1219 }
  0xb0   : > { %v504_v15 = vmul.f32 %v1220_v14, %v502_v13  ;;  %vm509_vm1 = vweird.f32 %v1220_v14  ;;  %v1222_v10 = vpop.eup %1221 }
  0xb1   : > { %vm510_vm3 = vmor %vm508_vm2, %vm509_vm1  ;;  %v720_v17 = vadd.f32 1.0, %v1222_v10 }
  0xb2   : > { %v505_v16 = vsub.f32 1.0, %v504_v15 }
  0xb3   : > { %vm726_vm7 = vweird.f32 %v720_v17 }
  0xb4   : > { %v506_v18 = vmul.f32 %v1220_v14, %v505_v16 }
  0xb6   : > { %v507_v20 = vadd.f32 %v1220_v14, %v506_v18 }
  0xb8   : > { %v511_v22 = vsel %vm510_vm3, %v1220_v14, %v507_v20 }
  0xb9   : > { %v516_v23 = vsel %vm513_vm4, %v515_v21, %v511_v22 }
  0xba   : > { %v1480_v24 = vmul.f32 %v516_v23, %v495_v7 }
  0xbc   : > { %v548_v25 = vpack.c.bf16 %v1480_v24, %v1480_v24 }
  0xbe   : > { %1091 = vmatmul.msk.bf16.vlgmr.msra.gmra.mxu2 %vm577_vm5, %v548_v25 }
 0x141   : > { %v590_v30 = vpop.f32.mrf.mxu2 }
 0x142   : > { %v591_v31 = vadd.f32 %v1212_v29, %v590_v30 }
 0x144   : > { %v594_v32 = vmax.f32 %v591_v31, 0.001 }
 0x146   : > { %v595_v33 = vmin.f32 %v594_v32, 0.1 }
 0x148   : > { %639 = vperm.xlu2 %1206, %v595_v33   ;;  %619 = vperm.xlu1 %1204, %v595_v33  }
 0x149   : > { %599 = vperm.xlu0 %1202, %v595_v33   ;;  %v592_v34 = vpop.f32.mrf.mxu2 }
 0x14a   : > { %v679_v34 = vlaneseq }
 0x150   : > { %1207 = vset.pattern.permute.xlu2 %v1318_v35  ;;  %1205 = vset.pattern.permute.xlu1 %v1319_v36 }
 0x151   : > { %1203 = vset.pattern.permute.xlu0 %v1320_v37  ;;  %649 = vperm.xlu2 %1207, %v595_v33  }
 0x152   : > { %629 = vperm.xlu1 %1205, %v595_v33   ;;  %609 = vperm.xlu0 %1203, %v595_v33  }
 0x159   : > { %1209 = vset.pattern.permute.xlu2 %v1321_v38 }
 0x15a   : > { %1208 = vset.pattern.permute.xlu1 %v1322_v39  ;;  %669 = vperm.xlu2 %1209, %v595_v33  }
 0x15b   : > { %659 = vperm.xlu1 %1208, %v595_v33   ;;  %1210 = vset.pattern.permute.xlu0 %v1321_v38 }
 0x1a2   : > { %v1490_v42 = vpop.permute.xlu2 %639 }
 0x1a3   : > { %v643_v63 = vmul.f32 %v642_v53, %v1490_v42 }
 0x1a5   : > { %v644_v7 = vmul.f32 1.442695, %v643_v63 }
 0x1ab   : > { %v1495_v48 = vpop.permute.xlu2 %649 }
 0x1ac   : > { %v653_v3 = vmul.f32 %v652_v55, %v1495_v48 }
 0x1ae   : > { %v654_v11 = vmul.f32 1.442695, %v653_v3 }
 0x1b4   : > { %v670_v6 = vpop.permute.xlu2 %669 }
 0x1b5   : > { %v673_v12 = vmul.f32 %v672_v4, %v670_v6 }
 0x1b7   : > { %v674_v19 = vmul.f32 1.442695, %v673_v12 }
 0x1ba   : > { %v620_v43 = vpop.permute.xlu1 %619 }
 0x1bb   : > { %v600_v45 = vpop.permute.xlu0 %599  ;;  %v623_v50 = vmul.f32 %v622_v47, %v620_v43 }
 0x1bc   : > { %v603_v49 = vmul.f32 %v602_v46, %v600_v45 }
 0x1bd   : > { %v624_v59 = vmul.f32 1.442695, %v623_v50 }
 0x1be   : > { %v604_v56 = vmul.f32 1.442695, %v603_v49 }
 0x1c0   : > { %1223 = vpow2.f32 %v604_v56  ;;  %v730_v56 = vand.u32 2147483647, %v720_v17 }
 0x1c1   : > { %1225 = vpow2.f32 %v624_v59 }
 0x1c2   : > { %vm731_vm11 = vcmp.eq.f32.partialorder %v730_v56, 8.507059e+37 }
 0x1c4   : > { %v630_v57 = vpop.permute.xlu1 %629  ;;  %v610_v58 = vpop.permute.xlu0 %609 }
 0x1c5   : > { %v633_v60 = vmul.f32 %v632_v51, %v630_v57  ;;  %v613_v61 = vmul.f32 %v612_v52, %v610_v58 }
 0x1c6   : > { %v1224_v14 = vpop.eup %1223 }
 0x1c7   : > { %v614_v0 = vmul.f32 1.442695, %v613_v61  ;;  %v634_v5 = vmul.f32 1.442695, %v633_v60  ;;  %v1226_v16 = vpop.eup %1225  ;;  %v606_v21 = vmul.f32 %v1224_v14, %v600_v45  ;;  %v1211_v60 = vld [vmem:[%s1596_s6] ss:$0 sm:$0xff] }
 0x1c8   : > { %v626_v25 = vmul.f32 %v1226_v16, %v620_v43  ;;  %v680_v43 = vshrl.u32 %v679_v34, 7  ;;  %v715_v3 = vmul.f32 %v1211_v60, %v1480_v24 }
 0x1c9   : > { %1227 = vpow2.f32 %v614_v0 }
 0x1ca   : > { %1229 = vpow2.f32 %v634_v5  ;;  %v685_v50 = vand.u32 7, %v680_v43 }
 0x1cb   : > { %1231 = vpow2.f32 %v644_v7 }
 0x1cc   : > { %1233 = vpow2.f32 %v654_v11  ;;  %vm694_vm6 = vcmp.ge.s32.totalorder %v685_v50, 1  ;;  %vm700_vm10 = vcmp.ge.s32.totalorder %v685_v50, 2  ;;  %vm706_vm12 = vcmp.ge.s32.totalorder %v685_v50, 4  ;;  %v1213_v50 = vld [vmem:[%s1598_s8] ss:$0 sm:$0xff] }
 0x1cd   : > { %v660_v13 = vpop.permute.xlu1 %659 }
 0x1ce   : > { %v663_v15 = vmul.f32 %v662_v8, %v660_v13 }
 0x1cf   : > { %v1228_v18 = vpop.eup %1227 }
 0x1d0   : > { %v664_v20 = vmul.f32 1.442695, %v663_v15  ;;  %v616_v22 = vmul.f32 %v1228_v18, %v610_v58  ;;  %v1230_v23 = vpop.eup %1229 }
 0x1d1   : > { %v1232_v27 = vpop.eup %1231  ;;  %v636_v28 = vmul.f32 %v1230_v23, %v630_v57  ;;  %v1147_v23 = vld [vmem:[%s1600_s10] sm:$0xff] }
 0x1d2   : > { %1235 = vpow2.f32 %v664_v20  ;;  %v617_v26 = vadd.f32 %v616_v22, %v606_v21  ;;  %v1234_v30 = vpop.eup %1233  ;;  %v646_v31 = vmul.f32 %v1232_v27, %v1490_v42  ;;  %v1148_v22 = vld [vmem:[%s1600_s10 + $0x8] sm:$0xff] }
 0x1d3   : > { %1237 = vrcp.f32 %v720_v17  ;;  %v656_v36 = vmul.f32 %v1234_v30, %v1495_v48  ;;  %v732_v48 = vand.u32 2147483648, %v720_v17  ;;  %865 = vmatpush.bf16.msrb.mxu0 %v1148_v22 }
 0x1d4   : > { %1239 = vpow2.f32 %v674_v19  ;;  %v627_v29 = vadd.f32 %v626_v25, %v617_v26 }
 0x1d5   : > { %v733_v59 = vor.u32 1.1754944e-38, %v732_v48 }
 0x1d6   : > { %v637_v32 = vadd.f32 %v636_v28, %v627_v29 }
 0x1d7   : > { %866 = vmatpush.bf16.msrb.mxu0 %v1147_v23 }
 0x1d8   : > { %v1236_v33 = vpop.eup %1235  ;;  %v647_v37 = vadd.f32 %v646_v31, %v637_v32 }
 0x1d9   : > { %v1238_v35 = vpop.eup %1237  ;;  %v666_v38 = vmul.f32 %v1236_v33, %v660_v13  ;;  %v1323_v13 = vmov 32.0  }
 0x1da   : > { %v1240_v39 = vpop.eup %1239  ;;  %v657_v41 = vadd.f32 %v656_v36, %v647_v37  ;;  %v722_v44 = vmul.f32 %v1238_v35, %v720_v17  ;;  %vm727_vm8 = vweird.f32 %v1238_v35  ;;  %1241 = vrcp.f32 %v1323_v13 }
 0x1db   : > { %v676_v45 = vmul.f32 %v1240_v39, %v670_v6  ;;  %vm728_vm9 = vmor %vm726_vm7, %vm727_vm8 }
 0x1dc   : > { %v667_v46 = vadd.f32 %v666_v38, %v657_v41  ;;  %v723_v49 = vsub.f32 1.0, %v722_v44 }
 0x1de   : > { %v677_v47 = vadd.f32 %v676_v45, %v667_v46  ;;  %v724_v52 = vmul.f32 %v1238_v35, %v723_v49 }
 0x1e0   : > { %v678_v51 = vmul.f32 %v677_v47, %v1480_v24  ;;  %v725_v55 = vadd.f32 %v1238_v35, %v724_v52  ;;  %v1242_v24 = vpop.eup %1241  ;;  %v1214_v52 = vld [vmem:[%s1599_s9] ss:$0 sm:$0xff] }
 0x1e1   : > { %v784_v14 = vmul.f32 32.0, %v1242_v24  ;;  %vm788_vm13 = vweird.f32 %v1242_v24 }
 0x1e2   : > { %v693_v42 = vrot.slane %v678_v51, 7  ;;  %v729_v61 = vsel %vm728_vm9, %v1238_v35, %v725_v55  ;;  %v1324_v55 = vmov 1.4142135  }
 0x1e3   : > { %v734_v0 = vsel %vm731_vm11, %v733_v59, %v729_v61  ;;  %v785_v15 = vsub.f32 1.0, %v784_v14  ;;  %v1215_v61 = vld [vmem:[%s1601_s11] ss:$0 sm:$0xff] }
 0x1e4   : > { %v695_v53 = vadd.f32 %v693_v42, %v678_v51  ;;  %v736_v5 = vmul.f32 %v734_v0, %v1488_v40 }
 0x1e5   : > { %v786_v40 = vmul.f32 %v1242_v24, %v785_v15 }
 0x1e6   : > { %v698_v54 = vsel %vm694_vm6, %v695_v53, %v678_v51 }
 0x1e7   : > { %v699_v57 = vrot.slane %v698_v54, 6  ;;  %v787_v16 = vadd.f32 %v1242_v24, %v786_v40  ;;  %v1150_v40 = vld [vmem:[%s1602_s12 + $0x8] sm:$0xff] }
 0x1e9   : > { %v701_v58 = vadd.f32 %v699_v57, %v698_v54  ;;  %v789_v17 = vsel %vm788_vm13, %v1242_v24, %v787_v16 }
 0x1eb   : > { %v704_v62 = vsel %vm700_vm10, %v701_v58, %v698_v54  ;;  %vm960_vm10 = vcmask 523264  }
 0x1ec   : > { %v705_v63 = vrot.slane %v704_v62, 4 }
 0x1ee   : > { %v707_v1 = vadd.f32 %v705_v63, %v704_v62 }
 0x1f0   : > { %v710_v4 = vsel %vm706_vm12, %v707_v1, %v704_v62 }
 0x1f1   : > { %v716_v6 = vadd.f32 %v715_v3, %v710_v4 }
 0x1f3   : > { %v737_v7 = vmul.f32 %v736_v5, %v716_v6  ;;  %v1152_v6 = vld [vmem:[%s1602_s12 + $0x18] sm:$0xff] }
 0x1f4   : > { %968 = vmatpush.bf16.msrb.mxu1 %v1152_v6 }
 0x1f5   : > { %v738_v8 = vpack.c.bf16 %v737_v7, %v737_v7 }
 0x1f7   : > { %1105 = vmatmul.msk.bf16.vlgmr.msra.gmra.mxu3 %vm577_vm5, %v738_v8 }
 0x27a   : > { %v775_v9 = vpop.f32.mrf.mxu3 }
 0x27b   : > { %v1519_v10 = vadd.f32 %v775_v9, %v1459_v2 }
 0x27d   : > { %v780_v11 = vsel %vm482_vm0, %v1519_v10, 0.0 }
 0x27e   : > { %781 = vadd.xlane.f32.xlu0 %v780_v11 }
 0x282   : > { %v777_v12 = vpop.f32.mrf.mxu3 }
 0x283   : > { %v1151_v12 = vld [vmem:[%s1602_s12 + $0x10] sm:$0xff] }
 0x284   : > { %969 = vmatpush.bf16.msrb.mxu1 %v1151_v12 }
 0x288   : > { %970 = vmatpush.bf16.msrb.mxu1 %v1150_v40 }
 0x2f1   : > { %v782_v18 = vpop.xlane.xlu0 %781 }
 0x2f2   : > { %v790_v19 = vmul.f32 %v789_v17, %v782_v18 }
 0x2f4   : > { %v791_v20 = vsub.f32 %v1519_v10, %v790_v19  ;;  %v1149_v19 = vld [vmem:[%s1602_s12] sm:$0xff] }
 0x2f5   : > { %971 = vmatpush.bf16.msrb.mxu1 %v1149_v19 }
 0x2f6   : > { %v792_v2 = vmul.f32 %v791_v20, %v791_v20 }
 0x2f8   : > { %v793_v21 = vsel %vm482_vm0, %v792_v2, 0.0 }
 0x2f9   : > { %794 = vadd.xlane.f32.xlu1 %v793_v21 }
 0x36c   : > { %v795_v25 = vpop.xlane.xlu1 %794 }
 0x36d   : > { %v796_v26 = vmul.f32 %v795_v25, %v789_v17 }
 0x36f   : > { %v797_v27 = vadd.f32 1e-05, %v796_v26 }
 0x371   : > { %1243 = vrsqrt.f32 %v797_v27  ;;  %vm805_vm14 = vcmp.eq.f32.partialorder %v797_v27, inf  ;;  %v808_v35 = vand.u32 2147483648, %v797_v27  ;;  %vm807_vm15 = vcmp.eq.f32.partialorder %v797_v27, 0.0 }
 0x377   : > { %v1244_v28 = vpop.eup %1243 }
 0x378   : > { %v799_v29 = vmul.f32 %v1244_v28, %v797_v27 }
 0x37a   : > { %v800_v30 = vmul.f32 %v1244_v28, %v799_v29 }
 0x37c   : > { %v801_v31 = vmul.f32 0.5, %v800_v30 }
 0x37e   : > { %v802_v32 = vsub.f32 1.5, %v801_v31 }
 0x380   : > { %v803_v33 = vmul.f32 %v1244_v28, %v802_v32 }
 0x382   : > { %v804_v34 = vmul.f32 %v803_v33, %v797_v27 }
 0x384   : > { %v806_v36 = vsel %vm805_vm14, %v797_v27, %v804_v34 }
 0x385   : > { %v809_v37 = vsel %vm807_vm15, %v808_v35, %v806_v36 }
 0x386   : > { %1245 = vrcp.f32 %v809_v37  ;;  %v821_v44 = vand.u32 2147483648, %v809_v37  ;;  %v819_v45 = vand.u32 2147483647, %v809_v37  ;;  %vm815_vm2 = vweird.f32 %v809_v37 }
 0x387   : > { %1247 = vrcp.f32 %v1324_v55 }
 0x388   : > { %v822_v47 = vor.u32 1.1754944e-38, %v821_v44  ;;  %vm820_vm4 = vcmp.eq.f32.partialorder %v819_v45, 8.507059e+37 }
 0x38c   : > { %v1246_v38 = vpop.eup %1245 }
 0x38d   : > { %v811_v39 = vmul.f32 %v1246_v38, %v809_v37  ;;  %vm816_vm1 = vweird.f32 %v1246_v38  ;;  %v1248_v56 = vpop.eup %1247 }
 0x38e   : > { %vm817_vm3 = vmor %vm815_vm2, %vm816_vm1  ;;  %v874_v57 = vmul.f32 1.4142135, %v1248_v56  ;;  %vm878_vm5 = vweird.f32 %v1248_v56 }
 0x38f   : > { %v812_v41 = vsub.f32 1.0, %v811_v39 }
 0x390   : > { %v875_v58 = vsub.f32 1.0, %v874_v57 }
 0x391   : > { %v813_v43 = vmul.f32 %v1246_v38, %v812_v41 }
 0x392   : > { %v876_v59 = vmul.f32 %v1248_v56, %v875_v58 }
 0x393   : > { %v814_v46 = vadd.f32 %v1246_v38, %v813_v43 }
 0x394   : > { %v877_v60 = vadd.f32 %v1248_v56, %v876_v59 }
 0x395   : > { %v818_v49 = vsel %vm817_vm3, %v1246_v38, %v814_v46 }
 0x396   : > { %v823_v51 = vsel %vm820_vm4, %v822_v47, %v818_v49  ;;  %v879_v63 = vsel %vm878_vm5, %v1248_v56, %v877_v60  ;;  %v1216_v49 = vld [vmem:[%s1603_s13] ss:$0 sm:$0xff] }
 0x397   : > { %v824_v42 = vmul.f32 %v823_v51, %v791_v20 }
 0x399   : > { %v829_v53 = vmul.f32 %v1213_v50, %v824_v42 }
 0x39b   : > { %v834_v48 = vadd.f32 %v1214_v52, %v829_v53 }
 0x39d   : > { %v835_v54 = vpack.c.bf16 %v834_v48, %v834_v48 }
 0x39f   : > { %1114 = vmatmul.msk.bf16.vlgmr.msrb.gmra.mxu0 %vm482_vm0, %v835_v54 }
 0x41c   : > { %v868_v62 = vpop.f32.mrf.mxu0 }
 0x41d   : > { %v869_v0 = vadd.f32 %v1215_v61, %v868_v62 }
 0x41f   : > { %v880_v1 = vmul.f32 %v879_v63, %v869_v0  ;;  %v872_v43 = vmul.f32 0.5, %v869_v0 }
 0x421   : > { %v881_v3 = vmul.f32 %v880_v1, %v880_v1 }
 0x423   : > { %v882_v4 = vmin.f32 %v881_v3, 16.0 }
 0x424   : > { %v870_v5 = vpop.f32.mrf.mxu0 }
 0x425   : > { %v883_v7 = vmul.f32 2.1237322e-06, %v882_v4  ;;  %v894_v8 = vmul.f32 3.8918573e-05, %v882_v4 }
 0x427   : > { %v884_v9 = vadd.f32 0.00028619796, %v883_v7  ;;  %v895_v11 = vadd.f32 0.001143296, %v894_v8 }
 0x429   : > { %v885_v13 = vmul.f32 %v884_v9, %v882_v4  ;;  %v896_v24 = vmul.f32 %v895_v11, %v882_v4 }
 0x42b   : > { %v897_v14 = vadd.f32 0.014752088, %v896_v24  ;;  %v886_v15 = vadd.f32 0.0036580483, %v885_v13 }
 0x42d   : > { %v898_v16 = vmul.f32 %v897_v14, %v882_v4  ;;  %v887_v18 = vmul.f32 %v886_v15, %v882_v4 }
 0x42f   : > { %v899_v17 = vadd.f32 0.112945676, %v898_v16  ;;  %v888_v21 = vadd.f32 0.05243302, %v887_v18 }
 0x431   : > { %v900_v20 = vmul.f32 %v899_v17, %v882_v4  ;;  %v889_v25 = vmul.f32 %v888_v21, %v882_v4 }
 0x433   : > { %v901_v2 = vadd.f32 0.4994258, %v900_v20  ;;  %v890_v26 = vadd.f32 0.18741608, %v889_v25 }
 0x435   : > { %v902_v22 = vmul.f32 %v901_v2, %v882_v4  ;;  %v891_v28 = vmul.f32 %v890_v26, %v882_v4 }
 0x437   : > { %v903_v23 = vadd.f32 1.0, %v902_v22  ;;  %v892_v32 = vadd.f32 1.1283791, %v891_v28 }
 0x439   : > { %1249 = vrcp.f32 %v903_v23  ;;  %v915_v31 = vand.u32 2147483648, %v903_v23  ;;  %v913_v34 = vand.u32 2147483647, %v903_v23  ;;  %vm909_vm7 = vweird.f32 %v903_v23 }
 0x43a   : > { %v893_v37 = vmul.f32 %v892_v32, %v880_v1 }
 0x43b   : > { %v916_v36 = vor.u32 1.1754944e-38, %v915_v31  ;;  %vm914_vm9 = vcmp.eq.f32.partialorder %v913_v34, 8.507059e+37 }
 0x43f   : > { %v1250_v27 = vpop.eup %1249 }
 0x440   : > { %v905_v29 = vmul.f32 %v1250_v27, %v903_v23  ;;  %vm910_vm6 = vweird.f32 %v1250_v27 }
 0x441   : > { %vm911_vm8 = vmor %vm909_vm7, %vm910_vm6 }
 0x442   : > { %v906_v30 = vsub.f32 1.0, %v905_v29 }
 0x444   : > { %v907_v33 = vmul.f32 %v1250_v27, %v906_v30 }
 0x446   : > { %v908_v35 = vadd.f32 %v1250_v27, %v907_v33 }
 0x448   : > { %v912_v38 = vsel %vm911_vm8, %v1250_v27, %v908_v35 }
 0x449   : > { %v917_v39 = vsel %vm914_vm9, %v916_v36, %v912_v38 }
 0x44a   : > { %v918_v41 = vmul.f32 %v917_v39, %v893_v37 }
 0x44c   : > { %v1115_v44 = vclamps-f32 %v918_v41, 1.0 }
 0x44e   : > { %v921_v45 = vadd.f32 1.0, %v1115_v44 }
 0x450   : > { %v922_v46 = vmul.f32 %v921_v45, %v872_v43 }
 0x452   : > { %v923_v47 = vpack.c.bf16 %v922_v46, %v922_v46 }
 0x454   : > { %1132 = vmatmul.msk.bf16.vlgmr.msrb.gmra.mxu1 %vm960_vm10, %v923_v47 }
 0x4d1   : > { %v973_v50 = vpop.f32.mrf.mxu1 }
 0x4d2   : > { %v974_v51 = vadd.f32 %v1216_v49, %v973_v50 }
 0x4d4   : > { %v977_v42 = vadd.f32 %v974_v51, %v1519_v10 }
 0x4d6   : > { %978 = vst.msk [vmem:[%s458_s28] sm:$0xff] %vm482_vm0, %v977_v42 }
 0x4d7   : > { %1278 = shalt.err (!%p1275_p3)
}
 0x4d8   : > { %1153 = dma.vmem_to_hbm [thread:$0]  (%p1438_p5), %s993_s0, 128, %s995_s1, %s980_s17  }
 0x4d9   : > { %v975_v10 = vpop.f32.mrf.mxu1 }
 0x4da PF: > { %p1159_p4 = scmp.ge.s32.totalorder %s1313_s16, 2  ;;  %s1006_s22 = sand.u32 1, %s1301_s29  }
 0x4db   : > { %s1007_s27 = scalar_lea.sflag [#allocation3], %s1006_s22 }
 0x4dc   : > { %p1156_p7 = pnand %p1159_p4, %p1442_p6 }
 0x4de   : > { %p1157_p8 = pneg %p1156_p7 }
 0x4e0   : > { %1296 = dma.done.wait (%p1157_p8), %s1007_s27, 128  }
 0x4e1   : > { %1298 = vsyncadd (%p1157_p8), %s1007_s27, 4294967168  ;;  %s1616_s2 = sld [smem:[#allocation5_spill]]  ;;  %p24_p9 = scmp.ge.s32.totalorder %s1425_s19, 4  }
 0x4e2   : > { %s1617_s15 = sld [smem:[#allocation6_spill]]  ;;  %s1618_s29 = smov %s1305_s30 }
 0x4e3   : > { %s1620_s16 = smov %s1425_s19  ;;  %26 = sbr.rel (!%p24_p9) target bundleno = 7 (0x7), region = 111 }
 0x4e7   : > { %s1619_s30 = smov %s1616_s2 }
 0x4e8   :  { %1013 = vsyncpa [#allocation3], 1 }
 0x4e9   :  { %1015 = vsyncpa [#allocation3 + $0x1], 1 }

</bundles_post_ra>
